<compile_context>
chip_gen: v5e
topology: v5e:2x2
jax: 0.10.0
libtpu: 0.0.40
codegen_flags: <defaults>
</compile_context>

<pallas_src>
import jax
import jax.numpy as jnp
from jax.experimental import pallas as pl
from jax.experimental.pallas import tpu as pltpu

LEAKY_SLOPE = 0.01          # torch.nn.LeakyReLU default
GAMMA = 1.0                 # DSSM gamma
PRED_BIAS = 0.0             # PredictionLayer bias (init zeros)
IN_DIM = 100
HIDDEN = (300, 300, 128)    # logical (torch) hidden widths
HIDDEN_PAD = (384, 384, 128)  # lane-aligned widths used inside the kernel


# ----------------------------------------------------------------------------- kernel

def _layer(h_bf16, w_ref, b_ref):
    """One folded layer: bf16 matmul (f32 acc) + f32 bias + LeakyReLU."""
    h = jnp.dot(h_bf16, w_ref[...], preferred_element_type=jnp.float32)
    h = h + b_ref[...]                         # bias already includes folded BN shift
    return jnp.maximum(h, LEAKY_SLOPE * h)     # LeakyReLU(0.01)


def _tower(x_bf16, w1, b1, w2, b2, w3, b3):
    h = _layer(x_bf16, w1, b1)
    h = _layer(h.astype(jnp.bfloat16), w2, b2)
    h = _layer(h.astype(jnp.bfloat16), w3, b3)
    return h                                   # (TB, 128) f32


def dssm_kernel(xtf_ref, xtg_ref,
                tf_w1, tf_b1, tf_w2, tf_b2, tf_w3, tf_b3,
                tg_w1, tg_b1, tg_w2, tg_b2, tg_w3, tg_b3,
                out_ref):
    tf_emb = _tower(xtf_ref[...], tf_w1, tf_b1, tf_w2, tf_b2, tf_w3, tf_b3)
    tg_emb = _tower(xtg_ref[...], tg_w1, tg_b1, tg_w2, tg_b2, tg_w3, tg_b3)

    # Cosine_Similarity(TF_emb, TG_emb, gamma)
    dot = jnp.sum(tf_emb * tg_emb, axis=-1, keepdims=True)
    q2 = jnp.sum(tf_emb * tf_emb, axis=-1, keepdims=True)
    c2 = jnp.sum(tg_emb * tg_emb, axis=-1, keepdims=True)
    denom = jnp.sqrt(q2 * c2) + 1e-8           # == ||tf||*||tg|| + 1e-8 (single sqrt)
    cos = jnp.clip(dot / denom, -1.0, 1.0) * GAMMA

    # PredictionLayer(task='binary'): sigmoid(x + bias)
    out_ref[...] = 1.0 / (1.0 + jnp.exp(-(cos + PRED_BIAS)))


# ----------------------------------------------------------------------------- host wrapper

def _round_up(n, m):
    return ((n + m - 1) // m) * m


def _choose_tb(B):
    # Fill the MXU M dimension when batch allows; always a multiple of 8.
    if B >= 256:
        return 256
    return max(8, _round_up(B, 8))


def fold_and_pad_params(params):
    """Fold eval-mode BN + bias into (w', b') and zero-pad hidden dims to HIDDEN_PAD.

    w' = w * scale (per output column), b' = b * scale + shift.
    Zero-padded output columns produce exact zeros through LeakyReLU and meet
    zero-padded input rows of the next layer, so the math is unchanged.
    """
    dims_pad = (IN_DIM,) + HIDDEN_PAD
    folded = {}
    for tower in ("tf", "tg"):
        for li in range(3):
            w = params[f"{tower}_w{li+1}"]            # (in, out)  f32
            b = params[f"{tower}_b{li+1}"]            # (1, out)   f32
            s = params[f"{tower}_s{li+1}"]            # (1, out)   BN scale (eval, folded)
            t = params[f"{tower}_t{li+1}"]            # (1, out)   BN shift
            w_f = w * s
            b_f = b * s + t
            in_d, out_d = w.shape
            in_p, out_p = dims_pad[li], dims_pad[li + 1]
            w_pad = jnp.zeros((in_p, out_p), jnp.float32).at[:in_d, :out_d].set(w_f)
            b_pad = jnp.zeros((1, out_p), jnp.float32).at[:, :out_d].set(b_f)
            folded[f"{tower}_w{li+1}"] = w_pad.astype(jnp.bfloat16)   # MXU operand
            folded[f"{tower}_b{li+1}"] = b_pad                        # f32 epilogue
    return folded


def dssm_forward(x, params):
    """x: (B, 200) float32. params: raw per-tower weights/biases/BN params."""
    B = x.shape[0]
    TB = _choose_tb(B)
    num_tiles = pl.cdiv(B, TB)
    B_pad = num_tiles * TB

    # TODO(synk): for a production path, store TF/TG features pre-split and
    # lane-aligned (B, 256) to avoid these host-side slice copies of the input.
    x_tf = x[:, :IN_DIM].astype(jnp.bfloat16)
    x_tg = x[:, IN_DIM:2 * IN_DIM].astype(jnp.bfloat16)
    if B_pad != B:
        pad = ((0, B_pad - B), (0, 0))
        x_tf = jnp.pad(x_tf, pad)
        x_tg = jnp.pad(x_tg, pad)

    folded = fold_and_pad_params(params)

    ordered = [x_tf, x_tg]
    x_spec = pl.BlockSpec((TB, IN_DIM), lambda i: (i, 0))
    in_specs = [x_spec, x_spec]
    for tower in ("tf", "tg"):
        for li in range(3):
            w = folded[f"{tower}_w{li+1}"]
            b = folded[f"{tower}_b{li+1}"]
            ordered += [w, b]
            # Constant index maps -> weight/bias blocks stay resident in VMEM
            # across all grid steps (single DMA).
            in_specs += [pl.BlockSpec(w.shape, lambda i: (0, 0)),
                         pl.BlockSpec(b.shape, lambda i: (0, 0))]

    out = pl.pallas_call(
        dssm_kernel,
        out_shape=jax.ShapeDtypeStruct((B_pad, 1), jnp.float32),
        grid=(num_tiles,),
        in_specs=in_specs,
        out_specs=pl.BlockSpec((TB, 1), lambda i: (i, 0)),
        compiler_params=pltpu.CompilerParams(
            dimension_semantics=("parallel",),
            vmem_limit_bytes=32 * 1024 * 1024,
        ),
    )(*ordered)
    return out[:B, 0]   # (B,), padded rows dropped


# ----------------------------------------------------------------------------- params + refs

def make_params(key):
    """Deterministic synthetic params matching DSSM.__init__ shapes.

    BatchNorm1d is represented in eval mode as an affine scale/shift:
      scale = gamma/sqrt(var+eps), shift = beta - mean*scale.
    """
    dims = (IN_DIM,) + HIDDEN
    params = {}
    keys = jax.random.split(key, 64)
    ki = 0
    eps = 1e-5
    for tower in ("tf", "tg"):
        for li in range(3):
            fan_in, fan_out = dims[li], dims[li + 1]
            w = 0.05 * jax.random.normal(keys[ki], (fan_in, fan_out), jnp.float32); ki += 1
            b = 0.01 * jax.random.normal(keys[ki], (1, fan_out), jnp.float32); ki += 1
            gamma = 1.0 + 0.01 * jax.random.normal(keys[ki], (1, fan_out), jnp.float32); ki += 1
            beta = 0.01 * jax.random.normal(keys[ki], (1, fan_out), jnp.float32); ki += 1
            rmean = 0.01 * jax.random.normal(keys[ki], (1, fan_out), jnp.float32); ki += 1
            rvar = 1.0 + 0.1 * jnp.abs(jax.random.normal(keys[ki], (1, fan_out), jnp.float32)); ki += 1
            scale = gamma / jnp.sqrt(rvar + eps)
            shift = beta - rmean * scale
            params[f"{tower}_w{li+1}"] = w
            params[f"{tower}_b{li+1}"] = b
            params[f"{tower}_s{li+1}"] = scale
            params[f"{tower}_t{li+1}"] = shift
    return params


def dssm_reference_exact(x, params):
    """Pure-JAX f32 reference: original un-fused Linear -> BN(eval) -> LeakyReLU."""
    def tower(h, name):
        for li in range(3):
            w = params[f"{name}_w{li+1}"]; b = params[f"{name}_b{li+1}"]
            s = params[f"{name}_s{li+1}"]; t = params[f"{name}_t{li+1}"]
            h = h @ w + b
            h = h * s + t
            h = jnp.where(h > 0, h, LEAKY_SLOPE * h)
        return h
    tf_emb = tower(x[:, :IN_DIM], "tf")
    tg_emb = tower(x[:, IN_DIM:2 * IN_DIM], "tg")
    dot = jnp.sum(tf_emb * tg_emb, axis=-1)
    qn = jnp.linalg.norm(tf_emb, axis=-1)
    cn = jnp.linalg.norm(tg_emb, axis=-1)
    cos = jnp.clip(dot / (qn * cn + 1e-8), -1.0, 1.0) * GAMMA
    return 1.0 / (1.0 + jnp.exp(-(cos + PRED_BIAS)))


def dssm_reference_matched(x, params):
    """Reference matching the kernel numerics (folded BN, bf16 matmul operands, f32 acc)."""
    def tower(h, name):
        for li in range(3):
            w = params[f"{name}_w{li+1}"]; b = params[f"{name}_b{li+1}"]
            s = params[f"{name}_s{li+1}"]; t = params[f"{name}_t{li+1}"]
            wf = (w * s).astype(jnp.bfloat16)
            bf = b * s + t
            h = jnp.dot(h.astype(jnp.bfloat16), wf,
                        preferred_element_type=jnp.float32) + bf
            h = jnp.maximum(h, LEAKY_SLOPE * h)
        return h
    tf_emb = tower(x[:, :IN_DIM], "tf")
    tg_emb = tower(x[:, IN_DIM:2 * IN_DIM], "tg")
    dot = jnp.sum(tf_emb * tg_emb, axis=-1)
    q2 = jnp.sum(tf_emb * tf_emb, axis=-1)
    c2 = jnp.sum(tg_emb * tg_emb, axis=-1)
    cos = jnp.clip(dot / (jnp.sqrt(q2 * c2) + 1e-8), -1.0, 1.0) * GAMMA
    return 1.0 / (1.0 + jnp.exp(-(cos + PRED_BIAS)))


# ----------------------------------------------------------------------------- main

if __name__ == "__main__":
    key = jax.random.PRNGKey(0)
    k_x, k_p = jax.random.split(key)

    B = 8  # small batch for the check (kernel tiles to TB=8; serving batches tile to 256)
    x = jax.random.normal(k_x, (B, 2 * IN_DIM), jnp.float32)
    params = make_params(k_p)

    out = jax.block_until_ready(dssm_forward(x, params))
    ref_matched = jax.block_until_ready(dssm_reference_matched(x, params))
    ref_exact = jax.block_until_ready(dssm_reference_exact(x, params))

    assert out.shape == (B,), out.shape
    assert bool(jnp.all(jnp.isfinite(out)))
    # Tight check vs. a reference with identical numerics (folded BN + bf16 matmuls).
    assert jnp.allclose(out, ref_matched, atol=1e-4, rtol=1e-4), (out, ref_matched)
    # Loose check vs. the original f32 un-fused semantics (bf16 weight rounding only).
    assert jnp.allclose(out, ref_exact, atol=3e-2, rtol=3e-2), (out, ref_exact)
    print("KERNEL_OK")
</pallas_src>

<mosaic_0001>
module attributes {stable_mosaic.version = 11 : i64} {
  func.func @dssm_kernel(%arg0: i32, %arg1: memref<8x100xbf16, #tpu.memory_space<vmem>>, %arg2: memref<8x100xbf16, #tpu.memory_space<vmem>>, %arg3: memref<100x384xbf16, #tpu.memory_space<vmem>>, %arg4: memref<1x384xf32, #tpu.memory_space<vmem>>, %arg5: memref<384x384xbf16, #tpu.memory_space<vmem>>, %arg6: memref<1x384xf32, #tpu.memory_space<vmem>>, %arg7: memref<384x128xbf16, #tpu.memory_space<vmem>>, %arg8: memref<1x128xf32, #tpu.memory_space<vmem>>, %arg9: memref<100x384xbf16, #tpu.memory_space<vmem>>, %arg10: memref<1x384xf32, #tpu.memory_space<vmem>>, %arg11: memref<384x384xbf16, #tpu.memory_space<vmem>>, %arg12: memref<1x384xf32, #tpu.memory_space<vmem>>, %arg13: memref<384x128xbf16, #tpu.memory_space<vmem>>, %arg14: memref<1x128xf32, #tpu.memory_space<vmem>>, %arg15: memref<8x1xf32, #tpu.memory_space<vmem>>) attributes {dimension_semantics = [#tpu.dimension_semantics<parallel>], iteration_bounds = array<i64: 1>, scalar_prefetch = 0 : i64, scratch_operands = 0 : i64, tpu.core_type = #tpu.core_type<tc>, window_params = [{transform_indices = @transform_0, window_bounds = array<i64: 8, 100>}, {transform_indices = @transform_1, window_bounds = array<i64: 8, 100>}, {pipeline_mode = #tpu.pipeline_mode<synchronous>, transform_indices = @transform_2, window_bounds = array<i64: 100, 384>}, {pipeline_mode = #tpu.pipeline_mode<synchronous>, transform_indices = @transform_3, window_bounds = array<i64: 1, 384>}, {pipeline_mode = #tpu.pipeline_mode<synchronous>, transform_indices = @transform_4, window_bounds = array<i64: 384, 384>}, {pipeline_mode = #tpu.pipeline_mode<synchronous>, transform_indices = @transform_5, window_bounds = array<i64: 1, 384>}, {pipeline_mode = #tpu.pipeline_mode<synchronous>, transform_indices = @transform_6, window_bounds = array<i64: 384, 128>}, {pipeline_mode = #tpu.pipeline_mode<synchronous>, transform_indices = @transform_7, window_bounds = array<i64: 1, 128>}, {pipeline_mode = #tpu.pipeline_mode<synchronous>, transform_indices = @transform_8, window_bounds = array<i64: 100, 384>}, {pipeline_mode = #tpu.pipeline_mode<synchronous>, transform_indices = @transform_9, window_bounds = array<i64: 1, 384>}, {pipeline_mode = #tpu.pipeline_mode<synchronous>, transform_indices = @transform_10, window_bounds = array<i64: 384, 384>}, {pipeline_mode = #tpu.pipeline_mode<synchronous>, transform_indices = @transform_11, window_bounds = array<i64: 1, 384>}, {pipeline_mode = #tpu.pipeline_mode<synchronous>, transform_indices = @transform_12, window_bounds = array<i64: 384, 128>}, {pipeline_mode = #tpu.pipeline_mode<synchronous>, transform_indices = @transform_13, window_bounds = array<i64: 1, 128>}, {transform_indices = @transform_14, window_bounds = array<i64: 8, 1>}]} {
    %c0 = arith.constant 0 : index
    %c0_0 = arith.constant 0 : index
    %0 = vector.load %arg1[%c0, %c0_0] : memref<8x100xbf16, #tpu.memory_space<vmem>>, vector<8x100xbf16>
    %c0_1 = arith.constant 0 : index
    %c0_2 = arith.constant 0 : index
    %1 = vector.load %arg3[%c0_1, %c0_2] : memref<100x384xbf16, #tpu.memory_space<vmem>>, vector<100x384xbf16>
    %cst = arith.constant dense<0.000000e+00> : vector<8x384xf32>
    %2 = tpu.matmul %0, %1, %cst {dimension_numbers = #tpu.dot_dimension_numbers<[1], [0], [0], [1], [0, 0, 1, 1], [], []>} : vector<8x100xbf16>, vector<100x384xbf16>, vector<8x384xf32> -> vector<8x384xf32>
    %c0_3 = arith.constant 0 : index
    %c0_4 = arith.constant 0 : index
    %3 = vector.load %arg4[%c0_3, %c0_4] : memref<1x384xf32, #tpu.memory_space<vmem>>, vector<1x384xf32>
    %4 = vector.broadcast %3 : vector<1x384xf32> to vector<8x384xf32>
    %5 = arith.addf %2, %4 : vector<8x384xf32>
    %cst_5 = arith.constant 0.00999999977 : f32
    %6 = vector.broadcast %cst_5 : f32 to vector<8x384xf32>
    %7 = arith.mulf %6, %5 : vector<8x384xf32>
    %8 = arith.maximumf %5, %7 : vector<8x384xf32>
    %9 = arith.truncf %8 : vector<8x384xf32> to vector<8x384xbf16>
    %c0_6 = arith.constant 0 : index
    %c0_7 = arith.constant 0 : index
    %10 = vector.load %arg5[%c0_6, %c0_7] : memref<384x384xbf16, #tpu.memory_space<vmem>>, vector<384x384xbf16>
    %cst_8 = arith.constant dense<0.000000e+00> : vector<8x384xf32>
    %11 = tpu.matmul %9, %10, %cst_8 {dimension_numbers = #tpu.dot_dimension_numbers<[1], [0], [0], [1], [0, 0, 1, 1], [], []>} : vector<8x384xbf16>, vector<384x384xbf16>, vector<8x384xf32> -> vector<8x384xf32>
    %c0_9 = arith.constant 0 : index
    %c0_10 = arith.constant 0 : index
    %12 = vector.load %arg6[%c0_9, %c0_10] : memref<1x384xf32, #tpu.memory_space<vmem>>, vector<1x384xf32>
    %13 = vector.broadcast %12 : vector<1x384xf32> to vector<8x384xf32>
    %14 = arith.addf %11, %13 : vector<8x384xf32>
    %cst_11 = arith.constant 0.00999999977 : f32
    %15 = vector.broadcast %cst_11 : f32 to vector<8x384xf32>
    %16 = arith.mulf %15, %14 : vector<8x384xf32>
    %17 = arith.maximumf %14, %16 : vector<8x384xf32>
    %18 = arith.truncf %17 : vector<8x384xf32> to vector<8x384xbf16>
    %c0_12 = arith.constant 0 : index
    %c0_13 = arith.constant 0 : index
    %19 = vector.load %arg7[%c0_12, %c0_13] : memref<384x128xbf16, #tpu.memory_space<vmem>>, vector<384x128xbf16>
    %cst_14 = arith.constant dense<0.000000e+00> : vector<8x128xf32>
    %20 = tpu.matmul %18, %19, %cst_14 {dimension_numbers = #tpu.dot_dimension_numbers<[1], [0], [0], [1], [0, 0, 1, 1], [], []>} : vector<8x384xbf16>, vector<384x128xbf16>, vector<8x128xf32> -> vector<8x128xf32>
    %c0_15 = arith.constant 0 : index
    %c0_16 = arith.constant 0 : index
    %21 = vector.load %arg8[%c0_15, %c0_16] : memref<1x128xf32, #tpu.memory_space<vmem>>, vector<1x128xf32>
    %22 = vector.broadcast %21 : vector<1x128xf32> to vector<8x128xf32>
    %23 = arith.addf %20, %22 : vector<8x128xf32>
    %cst_17 = arith.constant 0.00999999977 : f32
    %24 = vector.broadcast %cst_17 : f32 to vector<8x128xf32>
    %25 = arith.mulf %24, %23 : vector<8x128xf32>
    %26 = arith.maximumf %23, %25 : vector<8x128xf32>
    %c0_18 = arith.constant 0 : index
    %c0_19 = arith.constant 0 : index
    %27 = vector.load %arg2[%c0_18, %c0_19] : memref<8x100xbf16, #tpu.memory_space<vmem>>, vector<8x100xbf16>
    %c0_20 = arith.constant 0 : index
    %c0_21 = arith.constant 0 : index
    %28 = vector.load %arg9[%c0_20, %c0_21] : memref<100x384xbf16, #tpu.memory_space<vmem>>, vector<100x384xbf16>
    %cst_22 = arith.constant dense<0.000000e+00> : vector<8x384xf32>
    %29 = tpu.matmul %27, %28, %cst_22 {dimension_numbers = #tpu.dot_dimension_numbers<[1], [0], [0], [1], [0, 0, 1, 1], [], []>} : vector<8x100xbf16>, vector<100x384xbf16>, vector<8x384xf32> -> vector<8x384xf32>
    %c0_23 = arith.constant 0 : index
    %c0_24 = arith.constant 0 : index
    %30 = vector.load %arg10[%c0_23, %c0_24] : memref<1x384xf32, #tpu.memory_space<vmem>>, vector<1x384xf32>
    %31 = vector.broadcast %30 : vector<1x384xf32> to vector<8x384xf32>
    %32 = arith.addf %29, %31 : vector<8x384xf32>
    %cst_25 = arith.constant 0.00999999977 : f32
    %33 = vector.broadcast %cst_25 : f32 to vector<8x384xf32>
    %34 = arith.mulf %33, %32 : vector<8x384xf32>
    %35 = arith.maximumf %32, %34 : vector<8x384xf32>
    %36 = arith.truncf %35 : vector<8x384xf32> to vector<8x384xbf16>
    %c0_26 = arith.constant 0 : index
    %c0_27 = arith.constant 0 : index
    %37 = vector.load %arg11[%c0_26, %c0_27] : memref<384x384xbf16, #tpu.memory_space<vmem>>, vector<384x384xbf16>
    %cst_28 = arith.constant dense<0.000000e+00> : vector<8x384xf32>
    %38 = tpu.matmul %36, %37, %cst_28 {dimension_numbers = #tpu.dot_dimension_numbers<[1], [0], [0], [1], [0, 0, 1, 1], [], []>} : vector<8x384xbf16>, vector<384x384xbf16>, vector<8x384xf32> -> vector<8x384xf32>
    %c0_29 = arith.constant 0 : index
    %c0_30 = arith.constant 0 : index
    %39 = vector.load %arg12[%c0_29, %c0_30] : memref<1x384xf32, #tpu.memory_space<vmem>>, vector<1x384xf32>
    %40 = vector.broadcast %39 : vector<1x384xf32> to vector<8x384xf32>
    %41 = arith.addf %38, %40 : vector<8x384xf32>
    %cst_31 = arith.constant 0.00999999977 : f32
    %42 = vector.broadcast %cst_31 : f32 to vector<8x384xf32>
    %43 = arith.mulf %42, %41 : vector<8x384xf32>
    %44 = arith.maximumf %41, %43 : vector<8x384xf32>
    %45 = arith.truncf %44 : vector<8x384xf32> to vector<8x384xbf16>
    %c0_32 = arith.constant 0 : index
    %c0_33 = arith.constant 0 : index
    %46 = vector.load %arg13[%c0_32, %c0_33] : memref<384x128xbf16, #tpu.memory_space<vmem>>, vector<384x128xbf16>
    %cst_34 = arith.constant dense<0.000000e+00> : vector<8x128xf32>
    %47 = tpu.matmul %45, %46, %cst_34 {dimension_numbers = #tpu.dot_dimension_numbers<[1], [0], [0], [1], [0, 0, 1, 1], [], []>} : vector<8x384xbf16>, vector<384x128xbf16>, vector<8x128xf32> -> vector<8x128xf32>
    %c0_35 = arith.constant 0 : index
    %c0_36 = arith.constant 0 : index
    %48 = vector.load %arg14[%c0_35, %c0_36] : memref<1x128xf32, #tpu.memory_space<vmem>>, vector<1x128xf32>
    %49 = vector.broadcast %48 : vector<1x128xf32> to vector<8x128xf32>
    %50 = arith.addf %47, %49 : vector<8x128xf32>
    %cst_37 = arith.constant 0.00999999977 : f32
    %51 = vector.broadcast %cst_37 : f32 to vector<8x128xf32>
    %52 = arith.mulf %51, %50 : vector<8x128xf32>
    %53 = arith.maximumf %50, %52 : vector<8x128xf32>
    %54 = arith.mulf %26, %53 : vector<8x128xf32>
    %cst_38 = arith.constant dense<0.000000e+00> : vector<8xf32>
    %55 = vector.multi_reduction <add>, %54, %cst_38 [1] : vector<8x128xf32> to vector<8xf32>
    %56 = vector.shape_cast %55 : vector<8xf32> to vector<8x1xf32>
    %57 = arith.mulf %26, %26 : vector<8x128xf32>
    %cst_39 = arith.constant dense<0.000000e+00> : vector<8xf32>
    %58 = vector.multi_reduction <add>, %57, %cst_39 [1] : vector<8x128xf32> to vector<8xf32>
    %59 = vector.shape_cast %58 : vector<8xf32> to vector<8x1xf32>
    %60 = arith.mulf %53, %53 : vector<8x128xf32>
    %cst_40 = arith.constant dense<0.000000e+00> : vector<8xf32>
    %61 = vector.multi_reduction <add>, %60, %cst_40 [1] : vector<8x128xf32> to vector<8xf32>
    %62 = vector.shape_cast %61 : vector<8xf32> to vector<8x1xf32>
    %63 = arith.mulf %59, %62 : vector<8x1xf32>
    %64 = math.sqrt %63 : vector<8x1xf32>
    %cst_41 = arith.constant 9.99999993E-9 : f32
    %65 = vector.broadcast %cst_41 : f32 to vector<8x1xf32>
    %66 = arith.addf %64, %65 : vector<8x1xf32>
    %67 = arith.divf %56, %66 : vector<8x1xf32>
    %cst_42 = arith.constant -1.000000e+00 : f32
    %cst_43 = arith.constant 1.000000e+00 : f32
    %68 = vector.broadcast %cst_42 : f32 to vector<8x1xf32>
    %69 = arith.maximumf %68, %67 : vector<8x1xf32>
    %70 = vector.broadcast %cst_43 : f32 to vector<8x1xf32>
    %71 = arith.minimumf %70, %69 : vector<8x1xf32>
    %cst_44 = arith.constant 1.000000e+00 : f32
    %72 = vector.broadcast %cst_44 : f32 to vector<8x1xf32>
    %73 = arith.mulf %71, %72 : vector<8x1xf32>
    %cst_45 = arith.constant 0.000000e+00 : f32
    %74 = vector.broadcast %cst_45 : f32 to vector<8x1xf32>
    %75 = arith.addf %73, %74 : vector<8x1xf32>
    %cst_46 = arith.constant 0.000000e+00 : f32
    %76 = vector.broadcast %cst_46 : f32 to vector<8x1xf32>
    %77 = arith.subf %76, %75 : vector<8x1xf32>
    %78 = math.exp %77 : vector<8x1xf32>
    %cst_47 = arith.constant 1.000000e+00 : f32
    %79 = vector.broadcast %cst_47 : f32 to vector<8x1xf32>
    %80 = arith.addf %79, %78 : vector<8x1xf32>
    %cst_48 = arith.constant 1.000000e+00 : f32
    %81 = vector.broadcast %cst_48 : f32 to vector<8x1xf32>
    %82 = arith.divf %81, %80 : vector<8x1xf32>
    %c0_49 = arith.constant 0 : index
    %c0_50 = arith.constant 0 : index
    %83 = vector.load %arg15[%c0_49, %c0_50] : memref<8x1xf32, #tpu.memory_space<vmem>>, vector<8x1xf32>
    tpu.vector_store %arg15[%c0_49, %c0_50], %82 {strides = array<i32>} : memref<8x1xf32, #tpu.memory_space<vmem>>, vector<8x1xf32>,
    return
  }
  func.func @transform_0(%arg0: i32) -> (i32, i32) {
    %c0_i32 = arith.constant 0 : i32
    %c0_i32_0 = arith.constant 0 : i32
    return %arg0, %c0_i32 : i32, i32
  }
  func.func @transform_1(%arg0: i32) -> (i32, i32) {
    %c0_i32 = arith.constant 0 : i32
    %c0_i32_0 = arith.constant 0 : i32
    return %arg0, %c0_i32 : i32, i32
  }
  func.func @transform_2(%arg0: i32) -> (i32, i32) {
    %c0_i32 = arith.constant 0 : i32
    %c0_i32_0 = arith.constant 0 : i32
    %c0_i32_1 = arith.constant 0 : i32
    return %c0_i32, %c0_i32_0 : i32, i32
  }
  func.func @transform_3(%arg0: i32) -> (i32, i32) {
    %c0_i32 = arith.constant 0 : i32
    %c0_i32_0 = arith.constant 0 : i32
    %c0_i32_1 = arith.constant 0 : i32
    return %c0_i32, %c0_i32_0 : i32, i32
  }
  func.func @transform_4(%arg0: i32) -> (i32, i32) {
    %c0_i32 = arith.constant 0 : i32
    %c0_i32_0 = arith.constant 0 : i32
    %c0_i32_1 = arith.constant 0 : i32
    return %c0_i32, %c0_i32_0 : i32, i32
  }
  func.func @transform_5(%arg0: i32) -> (i32, i32) {
    %c0_i32 = arith.constant 0 : i32
    %c0_i32_0 = arith.constant 0 : i32
    %c0_i32_1 = arith.constant 0 : i32
    return %c0_i32, %c0_i32_0 : i32, i32
  }
  func.func @transform_6(%arg0: i32) -> (i32, i32) {
    %c0_i32 = arith.constant 0 : i32
    %c0_i32_0 = arith.constant 0 : i32
    %c0_i32_1 = arith.constant 0 : i32
    return %c0_i32, %c0_i32_0 : i32, i32
  }
  func.func @transform_7(%arg0: i32) -> (i32, i32) {
    %c0_i32 = arith.constant 0 : i32
    %c0_i32_0 = arith.constant 0 : i32
    %c0_i32_1 = arith.constant 0 : i32
    return %c0_i32, %c0_i32_0 : i32, i32
  }
  func.func @transform_8(%arg0: i32) -> (i32, i32) {
    %c0_i32 = arith.constant 0 : i32
    %c0_i32_0 = arith.constant 0 : i32
    %c0_i32_1 = arith.constant 0 : i32
    return %c0_i32, %c0_i32_0 : i32, i32
  }
  func.func @transform_9(%arg0: i32) -> (i32, i32) {
    %c0_i32 = arith.constant 0 : i32
    %c0_i32_0 = arith.constant 0 : i32
    %c0_i32_1 = arith.constant 0 : i32
    return %c0_i32, %c0_i32_0 : i32, i32
  }
  func.func @transform_10(%arg0: i32) -> (i32, i32) {
    %c0_i32 = arith.constant 0 : i32
    %c0_i32_0 = arith.constant 0 : i32
    %c0_i32_1 = arith.constant 0 : i32
    return %c0_i32, %c0_i32_0 : i32, i32
  }
  func.func @transform_11(%arg0: i32) -> (i32, i32) {
    %c0_i32 = arith.constant 0 : i32
    %c0_i32_0 = arith.constant 0 : i32
    %c0_i32_1 = arith.constant 0 : i32
    return %c0_i32, %c0_i32_0 : i32, i32
  }
  func.func @transform_12(%arg0: i32) -> (i32, i32) {
    %c0_i32 = arith.constant 0 : i32
    %c0_i32_0 = arith.constant 0 : i32
    %c0_i32_1 = arith.constant 0 : i32
    return %c0_i32, %c0_i32_0 : i32, i32
  }
  func.func @transform_13(%arg0: i32) -> (i32, i32) {
    %c0_i32 = arith.constant 0 : i32
    %c0_i32_0 = arith.constant 0 : i32
    %c0_i32_1 = arith.constant 0 : i32
    return %c0_i32, %c0_i32_0 : i32, i32
  }
  func.func @transform_14(%arg0: i32) -> (i32, i32) {
    %c0_i32 = arith.constant 0 : i32
    %c0_i32_0 = arith.constant 0 : i32
    return %arg0, %c0_i32 : i32, i32
  }
}

</mosaic_0001>

<bundles_post_ra>
// kernel: tpu_custom_call.1
= control target key start
LH: loop header
LB: loop body
LE: loop exit
PB: predicated region body
PF: predicated region fallthrough
CT: control target
= control target key end

     0   :  { %19 = vsyncpa [#allocation3], 0  ;;  %s3982_s0 = inlined_call_operand.hbm [shape: bf16[8,100], index: 0, kind: input, shape index: {}]   ;;  %s3983_s1 = inlined_call_operand.hbm [shape: bf16[8,100], index: 1, kind: input, shape index: {}]   ;;  %s3984_s2 = inlined_call_operand.hbm [shape: bf16[100,384], index: 2, kind: input, shape index: {}]   ;;  %s3985_s3 = inlined_call_operand.hbm [shape: f32[1,384], index: 3, kind: input, shape index: {}]   ;;  %s3986_s4 = inlined_call_operand.hbm [shape: bf16[384,384], index: 4, kind: input, shape index: {}]   ;;  %s3987_s5 = inlined_call_operand.vmem [shape: f32[1,384], index: 5, kind: input, shape index: {}]   ;;  %s3988_s6 = inlined_call_operand.hbm [shape: bf16[384,128], index: 6, kind: input, shape index: {}]   ;;  %s3989_s7 = inlined_call_operand.hbm [shape: f32[1,128], index: 7, kind: input, shape index: {}]   ;;  %s3990_s8 = inlined_call_operand.hbm [shape: bf16[100,384], index: 8, kind: input, shape index: {}]   ;;  %s3991_s9 = inlined_call_operand.vmem [shape: f32[1,384], index: 9, kind: input, shape index: {}]   ;;  %s3992_s10 = inlined_call_operand.hbm [shape: bf16[384,384], index: 10, kind: input, shape index: {}]   ;;  %s3993_s11 = inlined_call_operand.vmem [shape: f32[1,384], index: 11, kind: input, shape index: {}]   ;;  %s3994_s12 = inlined_call_operand.hbm [shape: bf16[384,128], index: 12, kind: input, shape index: {}]   ;;  %s3995_s13 = inlined_call_operand.vmem [shape: f32[1,128], index: 13, kind: input, shape index: {}]   ;;  %s3996_s14 = inlined_call_operand.vmem [shape: f32[8,1], index: 14, kind: output, shape index: {}]  }
   0x1   :  { %20 = vsyncpa [#allocation5], 0 }
   0x2   :  { %21 = vsyncpa [#allocation8], 0 }
   0x3   :  { %22 = vsyncpa [#allocation11], 0 }
   0x4   :  { %23 = vsyncpa [#allocation14], 0  ;;  %s41_s15 = sshll.u32 %s3983_s1, 4  ;;  %s42_s15 = int_to_ptr.hbm [resolvable:$true] %s41_s15 }
   0x5   :  { %24 = vsyncpa [#allocation17], 0  ;;  %s3793_s16 = smov [#allocation4]   ;;  %s65_s20 = sshll.u32 %s3985_s3, 4  ;;  %s66_s20 = int_to_ptr.hbm [resolvable:$true] %s65_s20 }
   0x6   :  { %s43_s17 = sshll.u32 %s3793_s16, 4  ;;  %s3794_s21 = smov [#allocation7]   ;;  %s44_s17 = int_to_ptr.vmem [resolvable:$true] %s43_s17 }
   0x7   :  { %46 = dma.hbm_to_vmem [thread:$0]  %s42_s15, 64, %s44_s17, [#allocation5]  }
   0x8   :  { %s67_s22 = sshll.u32 %s3794_s21, 4  ;;  %s90_s25 = sshll.u32 %s3988_s6, 4  ;;  %s68_s22 = int_to_ptr.vmem [resolvable:$true] %s67_s22  ;;  %s91_s25 = int_to_ptr.hbm [resolvable:$true] %s90_s25 }
   0x9   :  { %70 = dma.hbm_to_vmem [thread:$0]  %s66_s20, 48, %s68_s22, [#allocation8]  }
   0xa   :  { %s3795_s1 = smov [#allocation10]   ;;  %s3796_s27 = smov 64  }
   0xb   :  { %s92_s26 = sshll.u32 %s3795_s1, 4  ;;  %s3797_s28 = smov 4   ;;  %s93_s26 = int_to_ptr.vmem [resolvable:$true] %s92_s26 }
   0xc   :  { %98 = dma.hbm_to_vmem [thread:$0]  %s91_s25, 3072, %s93_s26, [#allocation11], %s3796_s27, %s3796_s27, %s3797_s28  }
   0xd   :  { %s114_s30 = sshll.u32 %s3990_s8, 4  ;;  %s3798_s15 = smov [#allocation13]   ;;  %s115_s30 = int_to_ptr.hbm [resolvable:$true] %s114_s30 }
   0xe   :  { %s116_s16 = sshll.u32 %s3798_s15, 4  ;;  %s30_s18 = sshll.u32 %s3982_s0, 4  ;;  %s117_s16 = int_to_ptr.vmem [resolvable:$true] %s116_s16  ;;  %s31_s18 = int_to_ptr.hbm [resolvable:$true] %s30_s18 }
   0xf   :  { %s3799_s19 = smov 192   ;;  %s3800_s20 = smov 12  }
  0x10   :  { %122 = dma.hbm_to_vmem [thread:$0]  %s115_s30, 2496, %s117_s16, [#allocation14], %s3799_s19, %s3799_s19, %s3800_s20  }
  0x11   :  { %s51_s23 = sshll.u32 %s3984_s2, 4  ;;  %s3801_s8 = smov [#allocation2]   ;;  %s52_s23 = int_to_ptr.hbm [resolvable:$true] %s51_s23 }
  0x12   :  { %s32_s24 = sshll.u32 %s3801_s8, 4  ;;  %s3802_s25 = smov [#allocation6]   ;;  %s33_s24 = int_to_ptr.vmem [resolvable:$true] %s32_s24 }
  0x13   :  { %35 = dma.hbm_to_vmem [thread:$0]  %s31_s18, 64, %s33_s24, [#allocation3]  }
  0x14   :  { %s53_s1 = sshll.u32 %s3802_s25, 4  ;;  %s75_s3 = sshll.u32 %s3986_s4, 4  ;;  %s54_s1 = int_to_ptr.vmem [resolvable:$true] %s53_s1  ;;  %s76_s3 = int_to_ptr.hbm [resolvable:$true] %s75_s3 }
  0x15   :  { %59 = dma.hbm_to_vmem [thread:$0]  %s52_s23, 2496, %s54_s1, [#allocation5], %s3799_s19, %s3799_s19, %s3800_s20  }
  0x16   :  { %s104_s2 = sshll.u32 %s3989_s7, 4  ;;  %s3803_s15 = smov [#allocation9]   ;;  %s105_s2 = int_to_ptr.hbm [resolvable:$true] %s104_s2 }
  0x17   :  { %s77_s16 = sshll.u32 %s3803_s15, 4  ;;  %s3804_s6 = smov [#allocation12]   ;;  %s78_s16 = int_to_ptr.vmem [resolvable:$true] %s77_s16 }
  0x18   :  { %83 = dma.hbm_to_vmem [thread:$0]  %s76_s3, 9216, %s78_s16, [#allocation8], %s3799_s19, %s3799_s19, %s3800_s20  }
  0x19   :  { %s106_s4 = sshll.u32 %s3804_s6, 4  ;;  %s129_s21 = sshll.u32 %s3992_s10, 4  ;;  %s107_s4 = int_to_ptr.vmem [resolvable:$true] %s106_s4  ;;  %s130_s21 = int_to_ptr.hbm [resolvable:$true] %s129_s21 }
  0x1a   :  { %109 = dma.hbm_to_vmem [thread:$0]  %s105_s2, 16, %s107_s4, [#allocation11]  }
  0x1b   :  { %s144_s7 = sshll.u32 %s3994_s12, 4  ;;  %s3805_s8 = smov [#allocation15]   ;;  %s145_s7 = int_to_ptr.hbm [resolvable:$true] %s144_s7 }
  0x1c   :  { %s131_s24 = sshll.u32 %s3805_s8, 4  ;;  %s3806_s25 = smov [#allocation16]   ;;  %s132_s24 = int_to_ptr.vmem [resolvable:$true] %s131_s24 }
  0x1d   :  { %137 = dma.hbm_to_vmem [thread:$0]  %s130_s21, 9216, %s132_s24, [#allocation14], %s3799_s19, %s3799_s19, %s3800_s20  }
  0x1e   :  { %s146_s1 = sshll.u32 %s3806_s25, 4  ;;  %s147_s1 = int_to_ptr.vmem [resolvable:$true] %s146_s1 }
  0x1f   :  { %152 = dma.hbm_to_vmem [thread:$0]  %s145_s7, 3072, %s147_s1, [#allocation17], %s3796_s27, %s3796_s27, %s3797_s28  }
  0x20   :  { %3781 = dma.done.wait [#allocation3], 64  }
  0x21   :  { %3782 = vsyncadd [#allocation3], 4294967232 }
  0x22   :  { %3783 = dma.done.wait [#allocation5], 2560  }
  0x23   :  { %3784 = vsyncadd [#allocation5], 4294964736 }
  0x24   :  { %3785 = dma.done.wait [#allocation8], 9264  }
  0x25   :  { %3786 = vsyncadd [#allocation8], 4294958032 }
  0x26   :  { %3787 = dma.done.wait [#allocation11], 3088  }
  0x27   :  { %3788 = vsyncadd [#allocation11], 4294964208 }
  0x28   :  { %3789 = dma.done.wait [#allocation14], 11712  }
  0x29   :  { %3790 = vsyncadd [#allocation14], 4294955584 }
  0x2a   :  { %3791 = dma.done.wait [#allocation17], 3072  }
  0x2b   :  { %3792 = vsyncadd [#allocation17], 4294964224  ;;  %v221_v0 = vld [vmem:[#allocation6 + $0x90] sm:$0x33]  ;;  %v222_v1 = vld [vmem:[#allocation6 + $0x98] sm:$0x3] }
  0x2c   :  { %v293_v2 = vunpack.c.l.b16 %v221_v0  ;;  %v294_v3 = vunpack.c.h.b16 %v221_v0  ;;  %v295_v4 = vunpack.c.l.b16 %v222_v1  ;;  %vm339_vm0 = vcmask 1041408   ;;  %v2432_v5 = vld [vmem:[#allocation6 + $0x78] sm:$0xf]  ;;  %v3305_v9 = vld [vmem:[#allocation6 + $0x80] sm:$0xf0] }
  0x2d   :  { %v3304_v10 = vld [vmem:[#allocation6 + $0x7c] sm:$0xf]  ;;  %v2434_v11 = vld [vmem:[#allocation6 + $0x84] sm:$0xf0]  ;;  %v2440_v12 = vld [vmem:[#allocation6 + $0x80] sm:$0xf]  ;;  %v2433_v17 = vor.u32 %v3305_v9, %v2432_v5 }
  0x2e   :  { %v314_v6 = vpack.c.b16 %v293_v2, %v293_v2  ;;  %v315_v7 = vpack.c.b16 %v294_v3, %v294_v3  ;;  %v316_v8 = vpack.c.b16 %v295_v4, %v295_v4  ;;  %v3306_v13 = vld [vmem:[#allocation6 + $0x88] sm:$0xf0]  ;;  %v2437_v18 = vor.u32 %v3304_v10, %v2434_v11  ;;  %v2420_v19 = vld [vmem:[#allocation6 + $0x60] sm:$0xf]  ;;  %v3301_v22 = vld [vmem:[#allocation6 + $0x64] sm:$0xf] }
  0x2f   :  { %v2441_v20 = vor.u32 %v3306_v13, %v2440_v12  ;;  %v3302_v21 = vld [vmem:[#allocation6 + $0x68] sm:$0xf0]  ;;  %v2422_v23 = vld [vmem:[#allocation6 + $0x6c] sm:$0xf0]  ;;  %v2428_v24 = vld [vmem:[#allocation6 + $0x68] sm:$0xf] }
  0x30   :  { %v341_v14 = vsel %vm339_vm0, %v314_v6, 0  ;;  %v344_v15 = vsel %vm339_vm0, %v315_v7, 0  ;;  %v347_v16 = vsel %vm339_vm0, %v316_v8, 0  ;;  %v3303_v25 = vld [vmem:[#allocation6 + $0x70] sm:$0xf0]  ;;  %v2421_v26 = vor.u32 %v3302_v21, %v2420_v19 }
  0x31   :  { %350 = vmatpush.bf16.msra.mxu0 %v341_v14  ;;  %363 = vmatpush.bf16.msra.mxu1 %v344_v15  ;;  %v2425_v27 = vor.u32 %v3301_v22, %v2422_v23  ;;  %v2408_v28 = vld [vmem:[#allocation6 + $0x48] sm:$0xf]  ;;  %v2429_v29 = vor.u32 %v3303_v25, %v2428_v24  ;;  %v3299_v30 = vld [vmem:[#allocation6 + $0x50] sm:$0xf0]  ;;  %v3298_v31 = vld [vmem:[#allocation6 + $0x4c] sm:$0xf] }
  0x32   :  { %376 = vmatpush.bf16.msra.mxu2 %v347_v16  ;;  %v2410_v32 = vld [vmem:[#allocation6 + $0x54] sm:$0xf0]  ;;  %v2416_v33 = vld [vmem:[#allocation6 + $0x50] sm:$0xf]  ;;  %v3300_v34 = vld [vmem:[#allocation6 + $0x58] sm:$0xf0]  ;;  %v2409_v37 = vor.u32 %v3299_v30, %v2408_v28 }
  0x33   :  { %v2396_v35 = vld [vmem:[#allocation6 + $0x30] sm:$0xf]  ;;  %v2531_v36 = vld [vmem:[#allocation9 + $0xa8] sm:$0xf]  ;;  %v2413_v38 = vor.u32 %v3298_v31, %v2410_v32  ;;  %v3329_v39 = vld [vmem:[#allocation9 + $0xb0] sm:$0xf0]  ;;  %v2417_v42 = vor.u32 %v3300_v34, %v2416_v33 }
  0x34   :  { %v2519_v40 = vld [vmem:[#allocation9 + $0x90] sm:$0xf]  ;;  %v3326_v41 = vld [vmem:[#allocation9 + $0x98] sm:$0xf0]  ;;  %v3295_v44 = vld [vmem:[#allocation6 + $0x34] sm:$0xf]  ;;  %v2532_v46 = vor.u32 %v3329_v39, %v2531_v36 }
  0x35   :  { %351 = vmatpush.bf16.msra.mxu0 %v2433_v17  ;;  %364 = vmatpush.bf16.msra.mxu1 %v2437_v18  ;;  %v3296_v43 = vld [vmem:[#allocation6 + $0x38] sm:$0xf0]  ;;  %v2398_v45 = vld [vmem:[#allocation6 + $0x3c] sm:$0xf0]  ;;  %v2404_v47 = vld [vmem:[#allocation6 + $0x38] sm:$0xf]  ;;  %v2520_v49 = vor.u32 %v3326_v41, %v2519_v40 }
  0x36   :  { %377 = vmatpush.bf16.msra.mxu2 %v2441_v20  ;;  %v3297_v48 = vld [vmem:[#allocation6 + $0x40] sm:$0xf0]  ;;  %885 = vmatpush.bf16.msra.mxu3 %v2532_v46  ;;  %v2397_v50 = vor.u32 %v3296_v43, %v2396_v35  ;;  %v2401_v51 = vor.u32 %v3295_v44, %v2398_v45  ;;  %v2384_v52 = vld [vmem:[#allocation6 + $0x18] sm:$0xf]  ;;  %v3292_v57 = vld [vmem:[#allocation6 + $0x1c] sm:$0xf] }
  0x37   :  { %v2507_v53 = vld [vmem:[#allocation9 + $0x78] sm:$0xf]  ;;  %v3323_v54 = vld [vmem:[#allocation9 + $0x80] sm:$0xf0]  ;;  %v2405_v55 = vor.u32 %v3297_v48, %v2404_v47  ;;  %v2386_v58 = vld [vmem:[#allocation6 + $0x24] sm:$0xf0] }
  0x38   :  { %v3293_v56 = vld [vmem:[#allocation6 + $0x20] sm:$0xf0]  ;;  %v2392_v59 = vld [vmem:[#allocation6 + $0x20] sm:$0xf]  ;;  %v3294_v60 = vld [vmem:[#allocation6 + $0x28] sm:$0xf0]  ;;  %v2508_v63 = vor.u32 %v3323_v54, %v2507_v53  ;;  %v2389_v1 = vor.u32 %v3292_v57, %v2386_v58 }
  0x39   :  { %352 = vmatpush.bf16.msra.mxu0 %v2421_v26  ;;  %365 = vmatpush.bf16.msra.mxu1 %v2425_v27  ;;  %v2372_v61 = vld [vmem:[#allocation6] sm:$0xf]  ;;  %v3290_v62 = vld [vmem:[#allocation6 + $0x8] sm:$0xf0]  ;;  %v2385_v0 = vor.u32 %v3293_v56, %v2384_v52  ;;  %v3289_v2 = vld [vmem:[#allocation6 + $0x4] sm:$0xf]  ;;  %v2393_v5 = vor.u32 %v3294_v60, %v2392_v59 }
  0x3a   :  { %378 = vmatpush.bf16.msra.mxu2 %v2429_v29  ;;  %886 = vmatpush.bf16.msra.mxu3 %v2520_v49  ;;  %v2495_v3 = vld [vmem:[#allocation9 + $0x60] sm:$0xf]  ;;  %v3320_v4 = vld [vmem:[#allocation9 + $0x68] sm:$0xf0]  ;;  %v2374_v6 = vld [vmem:[#allocation6 + $0xc] sm:$0xf0]  ;;  %v2373_v16 = vor.u32 %v3290_v62, %v2372_v61 }
  0x3b   :  { %v2380_v7 = vld [vmem:[#allocation6 + $0x8] sm:$0xf]  ;;  %v3291_v8 = vld [vmem:[#allocation6 + $0x10] sm:$0xf0]  ;;  %v3328_v11 = vld [vmem:[#allocation9 + $0xac] sm:$0xf]  ;;  %v2496_v12 = vor.u32 %v3320_v4, %v2495_v3  ;;  %v2377_v17 = vor.u32 %v3289_v2, %v2374_v6 }
  0x3c   :  { %v2627_v9 = vld [vmem:[#allocation9 + $0x168] sm:$0xf]  ;;  %v3353_v10 = vld [vmem:[#allocation9 + $0x170] sm:$0xf0]  ;;  %v2533_v13 = vld [vmem:[#allocation9 + $0xb4] sm:$0xf0]  ;;  %v2381_v18 = vor.u32 %v3291_v8, %v2380_v7 }
  0x3d   :  { %353 = vmatpush.bf16.msra.mxu0 %v2409_v37  ;;  %366 = vmatpush.bf16.msra.mxu1 %v2413_v38  ;;  %v2723_v14 = vld [vmem:[#allocation9 + $0x228] sm:$0xf]  ;;  %v3377_v15 = vld [vmem:[#allocation9 + $0x230] sm:$0xf0]  ;;  %v2628_v19 = vor.u32 %v3353_v10, %v2627_v9  ;;  %v2536_v22 = vor.u32 %v3328_v11, %v2533_v13  ;;  %v2615_v23 = vld [vmem:[#allocation9 + $0x150] sm:$0xf] }
  0x3e   :  { %379 = vmatpush.bf16.msra.mxu2 %v2417_v42  ;;  %887 = vmatpush.bf16.msra.mxu3 %v2508_v63  ;;  %v2483_v20 = vld [vmem:[#allocation9 + $0x48] sm:$0xf]  ;;  %v3317_v21 = vld [vmem:[#allocation9 + $0x50] sm:$0xf0]  ;;  %v3350_v24 = vld [vmem:[#allocation9 + $0x158] sm:$0xf0]  ;;  %v2724_v26 = vor.u32 %v3377_v15, %v2723_v14 }
  0x3f   :  { %v3325_v25 = vld [vmem:[#allocation9 + $0x94] sm:$0xf]  ;;  %v2521_v27 = vld [vmem:[#allocation9 + $0x9c] sm:$0xf0]  ;;  %v2711_v28 = vld [vmem:[#allocation9 + $0x210] sm:$0xf]  ;;  %v2484_v31 = vor.u32 %v3317_v21, %v2483_v20  ;;  %v2616_v32 = vor.u32 %v3350_v24, %v2615_v23 }
  0x40   :  { %v3374_v29 = vld [vmem:[#allocation9 + $0x218] sm:$0xf0]  ;;  %v196_v30 = vld [vmem:[#allocation2] sm:$0xf]  ;;  %vm335_vm1 = vcmask 818176   ;;  %v2524_v35 = vor.u32 %v3325_v25, %v2521_v27  ;;  %vm2358_vm10 = vcmask 7168  }
  0x41   :  { %354 = vmatpush.bf16.msra.mxu0 %v2397_v50  ;;  %367 = vmatpush.bf16.msra.mxu1 %v2401_v51  ;;  %v2471_v33 = vld [vmem:[#allocation9 + $0x30] sm:$0xf]  ;;  %v3314_v34 = vld [vmem:[#allocation9 + $0x38] sm:$0xf0]  ;;  %v2603_v36 = vld [vmem:[#allocation9 + $0x138] sm:$0xf]  ;;  %v2712_v39 = vor.u32 %v3374_v29, %v2711_v28 }
  0x42   :  { %380 = vmatpush.bf16.msra.mxu2 %v2405_v55  ;;  %888 = vmatpush.bf16.msra.mxu3 %v2496_v12  ;;  %v3347_v37 = vld [vmem:[#allocation9 + $0x140] sm:$0xf0]  ;;  %v3322_v38 = vld [vmem:[#allocation9 + $0x7c] sm:$0xf]  ;;  %v2509_v40 = vld [vmem:[#allocation9 + $0x84] sm:$0xf0]  ;;  %v2472_v43 = vor.u32 %v3314_v34, %v2471_v33 }
  0x43   :  { %v2699_v41 = vld [vmem:[#allocation9 + $0x1f8] sm:$0xf]  ;;  %v3371_v42 = vld [vmem:[#allocation9 + $0x200] sm:$0xf0]  ;;  %v2604_v44 = vor.u32 %v3347_v37, %v2603_v36  ;;  %v2512_v47 = vor.u32 %v3322_v38, %v2509_v40  ;;  %v2591_v48 = vld [vmem:[#allocation9 + $0x120] sm:$0xf] }
  0x44   :  { %v2459_v45 = vld [vmem:[#allocation9 + $0x18] sm:$0xf]  ;;  %v3311_v46 = vld [vmem:[#allocation9 + $0x20] sm:$0xf0]  ;;  %v3344_v49 = vld [vmem:[#allocation9 + $0x128] sm:$0xf0]  ;;  %v2700_v51 = vor.u32 %v3371_v42, %v2699_v41 }
  0x45   :  { %355 = vmatpush.bf16.msra.mxu0 %v2385_v0  ;;  %368 = vmatpush.bf16.msra.mxu1 %v2389_v1  ;;  %v3319_v50 = vld [vmem:[#allocation9 + $0x64] sm:$0xf]  ;;  %v2497_v52 = vld [vmem:[#allocation9 + $0x6c] sm:$0xf0]  ;;  %v2687_v53 = vld [vmem:[#allocation9 + $0x1e0] sm:$0xf]  ;;  %v2460_v55 = vor.u32 %v3311_v46, %v2459_v45  ;;  %v2592_v59 = vor.u32 %v3344_v49, %v2591_v48 }
  0x46   :  { %381 = vmatpush.bf16.msra.mxu2 %v2393_v5  ;;  %889 = vmatpush.bf16.msra.mxu3 %v2484_v31  ;;  %v3368_v54 = vld [vmem:[#allocation9 + $0x1e8] sm:$0xf0]  ;;  %v2447_v56 = vld [vmem:[#allocation9] sm:$0xf]  ;;  %v2579_v58 = vld [vmem:[#allocation9 + $0x108] sm:$0xf]  ;;  %v2500_v63 = vor.u32 %v3319_v50, %v2497_v52 }
  0x47   :  { %v3308_v57 = vld [vmem:[#allocation9 + $0x8] sm:$0xf0]  ;;  %v3341_v60 = vld [vmem:[#allocation9 + $0x110] sm:$0xf0]  ;;  %v2485_v62 = vld [vmem:[#allocation9 + $0x54] sm:$0xf0]  ;;  %v2688_v2 = vor.u32 %v3368_v54, %v2687_v53 }
  0x48   :  { %v3316_v61 = vld [vmem:[#allocation9 + $0x4c] sm:$0xf]  ;;  %v2629_v1 = vld [vmem:[#allocation9 + $0x174] sm:$0xf0]  ;;  %v2675_v3 = vld [vmem:[#allocation9 + $0x1c8] sm:$0xf]  ;;  %v2448_v5 = vor.u32 %v3308_v57, %v2447_v56  ;;  %v2580_v6 = vor.u32 %v3341_v60, %v2579_v58 }
  0x49   :  { %356 = vmatpush.bf16.msra.mxu0 %v2373_v16  ;;  %369 = vmatpush.bf16.msra.mxu1 %v2377_v17  ;;  %v3352_v0 = vld [vmem:[#allocation9 + $0x16c] sm:$0xf]  ;;  %v3365_v4 = vld [vmem:[#allocation9 + $0x1d0] sm:$0xf0]  ;;  %v2567_v8 = vld [vmem:[#allocation9 + $0xf0] sm:$0xf]  ;;  %v2488_v10 = vor.u32 %v3316_v61, %v2485_v62 }
  0x4a   :  { %382 = vmatpush.bf16.msra.mxu2 %v2381_v18  ;;  %890 = vmatpush.bf16.msra.mxu3 %v2472_v43  ;;  %v2632_v7 = vor.u32 %v3352_v0, %v2629_v1  ;;  %v3338_v9 = vld [vmem:[#allocation9 + $0xf8] sm:$0xf0]  ;;  %v3313_v11 = vld [vmem:[#allocation9 + $0x34] sm:$0xf]  ;;  %v2617_v13 = vld [vmem:[#allocation9 + $0x15c] sm:$0xf0]  ;;  %v2676_v14 = vor.u32 %v3365_v4, %v2675_v3 }
  0x4b   :  { %v3349_v12 = vld [vmem:[#allocation9 + $0x154] sm:$0xf]  ;;  %v2473_v15 = vld [vmem:[#allocation9 + $0x3c] sm:$0xf0]  ;;  %v2663_v16 = vld [vmem:[#allocation9 + $0x1b0] sm:$0xf]  ;;  %v2568_v18 = vor.u32 %v3338_v9, %v2567_v8 }
  0x4c   :  { %2442 = vmatmul.msk.bf16.vlgmr.msra.gmra.mxu0 %vm335_vm1, %v196_v30  ;;  %2443 = vmatmul.msk.bf16.vlgmr.msra.gmra.mxu1 %vm335_vm1, %v196_v30  ;;  %v3362_v17 = vld [vmem:[#allocation9 + $0x1b8] sm:$0xf0]  ;;  %v2555_v20 = vld [vmem:[#allocation9 + $0xd8] sm:$0xf]  ;;  %v3335_v21 = vld [vmem:[#allocation9 + $0xe0] sm:$0xf0] }
  0x4d   :  { %898 = vmatpush.bf16.msrb.mxu0 %v2628_v19  ;;  %911 = vmatpush.bf16.msrb.mxu1 %v2724_v26  ;;  %v2620_v19 = vor.u32 %v3349_v12, %v2617_v13  ;;  %v3310_v23 = vld [vmem:[#allocation9 + $0x1c] sm:$0xf]  ;;  %v2605_v25 = vld [vmem:[#allocation9 + $0x144] sm:$0xf0]  ;;  %v2664_v26 = vor.u32 %v3362_v17, %v2663_v16  ;;  %v2651_v28 = vld [vmem:[#allocation9 + $0x198] sm:$0xf] }
  0x4e   :  { %924 = vmatpush.bf16.msrb.mxu2 %v2536_v22  ;;  %891 = vmatpush.bf16.msra.mxu3 %v2460_v55  ;;  %v2476_v22 = vor.u32 %v3313_v11, %v2473_v15  ;;  %v3346_v24 = vld [vmem:[#allocation9 + $0x13c] sm:$0xf]  ;;  %v2461_v27 = vld [vmem:[#allocation9 + $0x24] sm:$0xf0]  ;;  %v3359_v29 = vld [vmem:[#allocation9 + $0x1a0] sm:$0xf0] }
  0x4f   :  { %2444 = vmatmul.msk.bf16.vlgmr.msra.gmra.mxu2 %vm335_vm1, %v196_v30  ;;  %v2556_v30 = vor.u32 %v3335_v21, %v2555_v20  ;;  %v2608_v31 = vor.u32 %v3346_v24, %v2605_v25  ;;  %v3332_v33 = vld [vmem:[#allocation9 + $0xc8] sm:$0xf0]  ;;  %v3307_v34 = vld [vmem:[#allocation9 + $0x4] sm:$0xf]  ;;  %v2449_v36 = vld [vmem:[#allocation9 + $0xc] sm:$0xf0] }
  0x50   :  { %v3343_v37 = vld [vmem:[#allocation9 + $0x124] sm:$0xf]  ;;  %v2593_v38 = vld [vmem:[#allocation9 + $0x12c] sm:$0xf0]  ;;  %v3376_v40 = vld [vmem:[#allocation9 + $0x22c] sm:$0xf]  ;;  %v2452_v48 = vor.u32 %v3307_v34, %v2449_v36 }
  0x51   :  { %899 = vmatpush.bf16.msrb.mxu0 %v2616_v32  ;;  %912 = vmatpush.bf16.msrb.mxu1 %v2712_v39  ;;  %v2543_v32 = vld [vmem:[#allocation9 + $0xc0] sm:$0xf]  ;;  %v2652_v39 = vor.u32 %v3359_v29, %v2651_v28  ;;  %v2725_v41 = vld [vmem:[#allocation9 + $0x234] sm:$0xf0]  ;;  %v2635_v42 = vld [vmem:[#allocation9 + $0x170] sm:$0xf] }
  0x52   :  { %925 = vmatpush.bf16.msrb.mxu2 %v2524_v35  ;;  %892 = vmatpush.bf16.msra.mxu3 %v2448_v5  ;;  %v2464_v35 = vor.u32 %v3310_v23, %v2461_v27  ;;  %v3354_v43 = vld [vmem:[#allocation9 + $0x178] sm:$0xf0]  ;;  %v3356_v45 = vld [vmem:[#allocation9 + $0x188] sm:$0xf0]  ;;  %v2544_v46 = vor.u32 %v3332_v33, %v2543_v32  ;;  %v2728_v49 = vor.u32 %v3376_v40, %v2725_v41  ;;  %v3373_v53 = vld [vmem:[#allocation9 + $0x214] sm:$0xf] }
  0x53   :  { %v3340_v50 = vld [vmem:[#allocation9 + $0x10c] sm:$0xf]  ;;  %v2636_v52 = vor.u32 %v3354_v43, %v2635_v42  ;;  %v2713_v54 = vld [vmem:[#allocation9 + $0x21c] sm:$0xf0]  ;;  %v2623_v56 = vld [vmem:[#allocation9 + $0x158] sm:$0xf] }
  0x54   :  { %v3351_v57 = vld [vmem:[#allocation9 + $0x160] sm:$0xf0]  ;;  %v2539_v61 = vld [vmem:[#allocation9 + $0xb0] sm:$0xf]  ;;  %v3330_v62 = vld [vmem:[#allocation9 + $0xb8] sm:$0xf0] }
  0x55   :  { %900 = vmatpush.bf16.msrb.mxu0 %v2604_v44  ;;  %913 = vmatpush.bf16.msrb.mxu1 %v2700_v51  ;;  %v2639_v44 = vld [vmem:[#allocation9 + $0x180] sm:$0xf]  ;;  %v2581_v51 = vld [vmem:[#allocation9 + $0x114] sm:$0xf0]  ;;  %v2624_v60 = vor.u32 %v3351_v57, %v2623_v56  ;;  %v3337_v0 = vld [vmem:[#allocation9 + $0xf4] sm:$0xf] }
  0x56   :  { %926 = vmatpush.bf16.msrb.mxu2 %v2512_v47  ;;  %937 = vmatpush.bf16.msrb.mxu3 %v2632_v7  ;;  %v2596_v47 = vor.u32 %v3343_v37, %v2593_v38  ;;  %v2640_v55 = vor.u32 %v3356_v45, %v2639_v44  ;;  %v2584_v58 = vor.u32 %v3340_v50, %v2581_v51  ;;  %v2569_v1 = vld [vmem:[#allocation9 + $0xfc] sm:$0xf0]  ;;  %v3370_v3 = vld [vmem:[#allocation9 + $0x1fc] sm:$0xf]  ;;  %v2701_v4 = vld [vmem:[#allocation9 + $0x204] sm:$0xf0] }
  0x57   :  { %v2704_v5 = vor.u32 %v3370_v3, %v2701_v4  ;;  %v3348_v7 = vld [vmem:[#allocation9 + $0x148] sm:$0xf0]  ;;  %v2527_v9 = vld [vmem:[#allocation9 + $0x98] sm:$0xf]  ;;  %v3334_v12 = vld [vmem:[#allocation9 + $0xdc] sm:$0xf] }
  0x58   :  { %v2557_v13 = vld [vmem:[#allocation9 + $0xe4] sm:$0xf0]  ;;  %v3367_v15 = vld [vmem:[#allocation9 + $0x1e4] sm:$0xf]  ;;  %v2689_v16 = vld [vmem:[#allocation9 + $0x1ec] sm:$0xf0] }
  0x59   :  { %901 = vmatpush.bf16.msrb.mxu0 %v2592_v59  ;;  %914 = vmatpush.bf16.msrb.mxu1 %v2688_v2  ;;  %v2716_v59 = vor.u32 %v3373_v53, %v2713_v54  ;;  %v2572_v2 = vor.u32 %v3337_v0, %v2569_v1  ;;  %v2599_v17 = vld [vmem:[#allocation9 + $0x128] sm:$0xf]  ;;  %v2515_v21 = vld [vmem:[#allocation9 + $0x80] sm:$0xf]  ;;  %v3331_v24 = vld [vmem:[#allocation9 + $0xc4] sm:$0xf] }
  0x5a   :  { %927 = vmatpush.bf16.msrb.mxu2 %v2500_v63  ;;  %938 = vmatpush.bf16.msrb.mxu3 %v2620_v19  ;;  %v2540_v63 = vor.u32 %v3330_v62, %v2539_v61  ;;  %v3345_v19 = vld [vmem:[#allocation9 + $0x130] sm:$0xf0]  ;;  %v2545_v25 = vld [vmem:[#allocation9 + $0xcc] sm:$0xf0]  ;;  %v3364_v27 = vld [vmem:[#allocation9 + $0x1cc] sm:$0xf] }
  0x5b   :  { %v2600_v20 = vor.u32 %v3345_v19, %v2599_v17  ;;  %v2677_v28 = vld [vmem:[#allocation9 + $0x1d4] sm:$0xf0]  ;;  %v2587_v29 = vld [vmem:[#allocation9 + $0x110] sm:$0xf]  ;;  %v2503_v33 = vld [vmem:[#allocation9 + $0x68] sm:$0xf] }
  0x5c   :  { %v3321_v34 = vld [vmem:[#allocation9 + $0x70] sm:$0xf0]  ;;  %v2665_v37 = vld [vmem:[#allocation9 + $0x1bc] sm:$0xf0]  ;;  %v2575_v38 = vld [vmem:[#allocation9 + $0xf8] sm:$0xf] }
  0x5d   :  { %902 = vmatpush.bf16.msrb.mxu0 %v2580_v6  ;;  %915 = vmatpush.bf16.msrb.mxu1 %v2676_v14  ;;  %v2611_v6 = vld [vmem:[#allocation9 + $0x140] sm:$0xf]  ;;  %v2560_v14 = vor.u32 %v3334_v12, %v2557_v13  ;;  %v3361_v36 = vld [vmem:[#allocation9 + $0x1b4] sm:$0xf]  ;;  %v3339_v40 = vld [vmem:[#allocation9 + $0x100] sm:$0xf0] }
  0x5e   :  { %928 = vmatpush.bf16.msrb.mxu2 %v2488_v10  ;;  %939 = vmatpush.bf16.msrb.mxu3 %v2608_v31  ;;  %v2612_v8 = vor.u32 %v3348_v7, %v2611_v6  ;;  %v3327_v10 = vld [vmem:[#allocation9 + $0xa0] sm:$0xf0]  ;;  %v3342_v31 = vld [vmem:[#allocation9 + $0x118] sm:$0xf0]  ;;  %v2576_v41 = vor.u32 %v3339_v40, %v2575_v38  ;;  %v2491_v42 = vld [vmem:[#allocation9 + $0x50] sm:$0xf] }
  0x5f   :  { %v2528_v11 = vor.u32 %v3327_v10, %v2527_v9  ;;  %v2588_v32 = vor.u32 %v3342_v31, %v2587_v29  ;;  %v3318_v43 = vld [vmem:[#allocation9 + $0x58] sm:$0xf0]  ;;  %v2479_v51 = vld [vmem:[#allocation9 + $0x38] sm:$0xf]  ;;  %v3355_v53 = vld [vmem:[#allocation9 + $0x184] sm:$0xf] }
  0x60   :  { %v2492_v44 = vor.u32 %v3318_v43, %v2491_v42  ;;  %v3358_v45 = vld [vmem:[#allocation9 + $0x19c] sm:$0xf]  ;;  %v2551_v56 = vld [vmem:[#allocation9 + $0xc8] sm:$0xf]  ;;  %v3333_v57 = vld [vmem:[#allocation9 + $0xd0] sm:$0xf0] }
  0x61   :  { %903 = vmatpush.bf16.msrb.mxu0 %v2568_v18  ;;  %916 = vmatpush.bf16.msrb.mxu1 %v2664_v26  ;;  %v2692_v18 = vor.u32 %v3367_v15, %v2689_v16  ;;  %v2548_v26 = vor.u32 %v3331_v24, %v2545_v25  ;;  %v3312_v61 = vld [vmem:[#allocation9 + $0x28] sm:$0xf0]  ;;  %v2455_v0 = vld [vmem:[#allocation9 + $0x8] sm:$0xf]  ;;  %v3309_v1 = vld [vmem:[#allocation9 + $0x10] sm:$0xf0] }
  0x62   :  { %929 = vmatpush.bf16.msrb.mxu2 %v2476_v22  ;;  %940 = vmatpush.bf16.msrb.mxu3 %v2596_v47  ;;  %v3324_v22 = vld [vmem:[#allocation9 + $0x88] sm:$0xf0]  ;;  %v2563_v47 = vld [vmem:[#allocation9 + $0xe0] sm:$0xf]  ;;  %v2731_v9 = vld [vmem:[#allocation9 + $0x230] sm:$0xf] }
  0x63   :  { %v2516_v23 = vor.u32 %v3324_v22, %v2515_v21  ;;  %v3378_v12 = vld [vmem:[#allocation9 + $0x238] sm:$0xf0]  ;;  %v3375_v21 = vld [vmem:[#allocation9 + $0x220] sm:$0xf0]  ;;  %v3372_v29 = vld [vmem:[#allocation9 + $0x208] sm:$0xf0] }
  0x64   :  { %v2732_v16 = vor.u32 %v3378_v12, %v2731_v9  ;;  %v3386_v25 = vld [vmem:[#allocation10 + $0x38] sm:$0xff]  ;;  %v3384_v38 = vld [vmem:[#allocation10 + $0x28] sm:$0xff]  ;;  %v3383_v43 = vld [vmem:[#allocation10 + $0x20] sm:$0xff] }
  0x65   :  { %904 = vmatpush.bf16.msrb.mxu0 %v2556_v30  ;;  %917 = vmatpush.bf16.msrb.mxu1 %v2652_v39  ;;  %v2680_v30 = vor.u32 %v3364_v27, %v2677_v28  ;;  %v2668_v39 = vor.u32 %v3361_v36, %v2665_v37  ;;  %v2707_v28 = vld [vmem:[#allocation9 + $0x200] sm:$0xf]  ;;  %v2695_v36 = vld [vmem:[#allocation9 + $0x1e8] sm:$0xf]  ;;  %v3369_v37 = vld [vmem:[#allocation9 + $0x1f0] sm:$0xf0] }
  0x66   :  { %930 = vmatpush.bf16.msrb.mxu2 %v2464_v35  ;;  %941 = vmatpush.bf16.msrb.mxu3 %v2584_v58  ;;  %v2504_v35 = vor.u32 %v3321_v34, %v2503_v33  ;;  %v2708_v34 = vor.u32 %v3372_v29, %v2707_v28  ;;  %v2696_v40 = vor.u32 %v3369_v37, %v2695_v36  ;;  %v3366_v42 = vld [vmem:[#allocation9 + $0x1d8] sm:$0xf0]  ;;  %v3380_v9 = vld [vmem:[#allocation10 + $0x8] sm:$0xff]  ;;  %v2881_v28 = vld [vmem:[#allocation13 + $0x6c] sm:$0xf0] }
  0x67   :  { %v3407_v12 = vld [vmem:[#allocation13 + $0x20] sm:$0xf0]  ;;  %v3402_v29 = vld [vmem:[#allocation10 + $0xb8] sm:$0xff]  ;;  %v3401_v36 = vld [vmem:[#allocation10 + $0xb0] sm:$0xff] }
  0x69   :  { %905 = vmatpush.bf16.msrb.mxu0 %v2544_v46  ;;  %918 = vmatpush.bf16.msrb.mxu1 %v2640_v55  ;;  %v2653_v46 = vld [vmem:[#allocation9 + $0x1a4] sm:$0xf0]  ;;  %v2641_v55 = vld [vmem:[#allocation9 + $0x18c] sm:$0xf0] }
  0x6a   :  { %931 = vmatpush.bf16.msrb.mxu2 %v2452_v48  ;;  %942 = vmatpush.bf16.msrb.mxu3 %v2572_v2  ;;  %v2656_v48 = vor.u32 %v3358_v45, %v2653_v46  ;;  %v2644_v58 = vor.u32 %v3355_v53, %v2641_v55  ;;  %v2456_v2 = vor.u32 %v3309_v1, %v2455_v0  ;;  %v2671_v45 = vld [vmem:[#allocation9 + $0x1b8] sm:$0xf]  ;;  %v3363_v46 = vld [vmem:[#allocation9 + $0x1c0] sm:$0xf0]  ;;  %v2647_v55 = vld [vmem:[#allocation9 + $0x188] sm:$0xf] }
  0x6b   :  { %v3416_v0 = vld [vmem:[#allocation13 + $0x68] sm:$0xf0] }
  0x6d   :  { %950 = vmatpush.bf16.msra.mxu0 %v2728_v49  ;;  %963 = vmatpush.bf16.msra.mxu1 %v2540_v63  ;;  %v3336_v49 = vld [vmem:[#allocation9 + $0xe8] sm:$0xf0]  ;;  %v223_v63 = vld [vmem:[#allocation7] sm:$0x7] }
  0x6e   :  { %976 = vmatpush.bf16.msra.mxu2 %v2636_v52  ;;  %943 = vmatpush.bf16.msrb.mxu3 %v2560_v14  ;;  %v2564_v50 = vor.u32 %v3336_v49, %v2563_v47  ;;  %v3315_v52 = vld [vmem:[#allocation9 + $0x40] sm:$0xf0]  ;;  %v225_v3 = vperm.slane %v223_v63, 0  ;;  %v226_v4 = vperm.slane %v223_v63, 1  ;;  %v227_v13 = vperm.slane %v223_v63, 2  ;;  %v3382_v47 = vld [vmem:[#allocation10 + $0x18] sm:$0xff] }
  0x6f   :  { %v2480_v54 = vor.u32 %v3315_v52, %v2479_v51  ;;  %v2672_v49 = vor.u32 %v3363_v46, %v2671_v45  ;;  %v3360_v51 = vld [vmem:[#allocation9 + $0x1a8] sm:$0xf0]  ;;  %v3381_v52 = vld [vmem:[#allocation10 + $0x10] sm:$0xff]  ;;  %v2879_v63 = vld [vmem:[#allocation13 + $0x60] sm:$0xf] }
  0x70   :  { %v2880_v1 = vor.u32 %v3416_v0, %v2879_v63  ;;  %v2899_v45 = vld [vmem:[#allocation13 + $0x80] sm:$0xf]  ;;  %v3420_v46 = vld [vmem:[#allocation13 + $0x88] sm:$0xf0] }
  0x71   :  { %951 = vmatpush.bf16.msra.mxu0 %v2716_v59  ;;  %964 = vmatpush.bf16.msra.mxu1 %v2528_v11  ;;  %v2552_v59 = vor.u32 %v3333_v57, %v2551_v56  ;;  %v3357_v56 = vld [vmem:[#allocation9 + $0x190] sm:$0xf0] }
  0x72   :  { %977 = vmatpush.bf16.msra.mxu2 %v2624_v60  ;;  %944 = vmatpush.bf16.msrb.mxu3 %v2548_v26  ;;  %v2467_v60 = vld [vmem:[#allocation9 + $0x20] sm:$0xf] }
  0x73   :  { %v2468_v62 = vor.u32 %v3312_v61, %v2467_v60  ;;  %v2891_v60 = vld [vmem:[#allocation13 + $0x78] sm:$0xf]  ;;  %v3419_v61 = vld [vmem:[#allocation13 + $0x80] sm:$0xf0] }
  0x75   :  { %952 = vmatpush.bf16.msra.mxu0 %v2704_v5  ;;  %965 = vmatpush.bf16.msra.mxu1 %v2516_v23 }
  0x76   :  { %978 = vmatpush.bf16.msra.mxu2 %v2612_v8 }
  0x79   :  { %953 = vmatpush.bf16.msra.mxu0 %v2692_v18  ;;  %966 = vmatpush.bf16.msra.mxu1 %v2504_v35 }
  0x7a   :  { %979 = vmatpush.bf16.msra.mxu2 %v2600_v20  ;;  %v2719_v20 = vld [vmem:[#allocation9 + $0x218] sm:$0xf] }
  0x7b   :  { %v2720_v27 = vor.u32 %v3375_v21, %v2719_v20  ;;  %v3404_v20 = vld [vmem:[#allocation13 + $0x8] sm:$0xf0] }
  0x7d   :  { %954 = vmatpush.bf16.msra.mxu0 %v2680_v30  ;;  %967 = vmatpush.bf16.msra.mxu1 %v2492_v44  ;;  %v3385_v30 = vld [vmem:[#allocation10 + $0x30] sm:$0xff] }
  0x7e   :  { %980 = vmatpush.bf16.msra.mxu2 %v2588_v32  ;;  %v3394_v32 = vld [vmem:[#allocation10 + $0x78] sm:$0xff] }
  0x81   :  { %955 = vmatpush.bf16.msra.mxu0 %v2668_v39  ;;  %968 = vmatpush.bf16.msra.mxu1 %v2480_v54  ;;  %v3393_v39 = vld [vmem:[#allocation10 + $0x70] sm:$0xff] }
  0x82   :  { %981 = vmatpush.bf16.msra.mxu2 %v2576_v41  ;;  %v2683_v41 = vld [vmem:[#allocation9 + $0x1d0] sm:$0xf] }
  0x83   :  { %v2684_v44 = vor.u32 %v3366_v42, %v2683_v41  ;;  %v3409_v41 = vld [vmem:[#allocation13 + $0x34] sm:$0xf]  ;;  %v2857_v42 = vld [vmem:[#allocation13 + $0x3c] sm:$0xf0] }
  0x85   :  { %956 = vmatpush.bf16.msra.mxu0 %v2656_v48  ;;  %969 = vmatpush.bf16.msra.mxu1 %v2468_v62  ;;  %v1273_v48 = vld [vmem:[#allocation13 + $0x90] sm:$0x33]  ;;  %v2892_v62 = vor.u32 %v3419_v61, %v2891_v60  ;;  %v3946_v60 = vld [vmem:[%s3987_s5] sm:$0x7] }
  0x86   :  { %982 = vmatpush.bf16.msra.mxu2 %v2564_v50  ;;  %v2659_v50 = vld [vmem:[#allocation9 + $0x1a0] sm:$0xf]  ;;  %v1345_v53 = vunpack.c.l.b16 %v1273_v48  ;;  %v2875_v61 = vld [vmem:[#allocation13 + $0x50] sm:$0xf]  ;;  %v495_v0 = vperm.slane %v3946_v60, 0 }
  0x87   :  { %v2660_v54 = vor.u32 %v3360_v51, %v2659_v50  ;;  %v3399_v50 = vld [vmem:[#allocation10 + $0xa0] sm:$0xff] }
  0x88   :  { %v1366_v57 = vpack.c.b16 %v1345_v53, %v1345_v53  ;;  %v3417_v53 = vld [vmem:[#allocation13 + $0x70] sm:$0xf0] }
  0x89   :  { %957 = vmatpush.bf16.msra.mxu0 %v2644_v58  ;;  %970 = vmatpush.bf16.msra.mxu1 %v2456_v2  ;;  %v2648_v58 = vor.u32 %v3357_v56, %v2647_v55  ;;  %v2867_v2 = vld [vmem:[#allocation13 + $0x48] sm:$0xf]  ;;  %v3403_v55 = vld [vmem:[#allocation13 + $0x4] sm:$0xf]  ;;  %v2833_v56 = vld [vmem:[#allocation13 + $0xc] sm:$0xf0] }
  0x8a   :  { %983 = vmatpush.bf16.msra.mxu2 %v2552_v59  ;;  %v1391_v59 = vsel %vm339_vm0, %v1366_v57, 0  ;;  %v3398_v57 = vld [vmem:[#allocation10 + $0x98] sm:$0xff] }
  0xc9   :  { %v358_v5 = vpop.f32.mrf.mxu0  ;;  %v371_v6 = vpop.f32.mrf.mxu1 }
  0xca   :  { %v359_v7 = vadd.f32 %v358_v5, %v225_v3  ;;  %v372_v8 = vadd.f32 %v371_v6, %v226_v4  ;;  %v3413_v3 = vld [vmem:[#allocation13 + $0x50] sm:$0xf0]  ;;  %v3392_v5 = vld [vmem:[#allocation10 + $0x68] sm:$0xff]  ;;  %v2855_v6 = vld [vmem:[#allocation13 + $0x30] sm:$0xf] }
  0xcb   :  { %v2868_v4 = vor.u32 %v3413_v3, %v2867_v2  ;;  %v2863_v2 = vld [vmem:[#allocation13 + $0x38] sm:$0xf]  ;;  %v3411_v3 = vld [vmem:[#allocation13 + $0x40] sm:$0xf0] }
  0xcc   :  { %v388_v10 = vmul.f32 0.01, %v359_v7  ;;  %v389_v11 = vmul.f32 0.01, %v372_v8 }
  0xce   :  { %v391_v14 = vmax.f32 %v359_v7, %v388_v10  ;;  %v392_v15 = vmax.f32 %v372_v8, %v389_v11  ;;  %v3410_v7 = vld [vmem:[#allocation13 + $0x38] sm:$0xf0]  ;;  %v2843_v11 = vld [vmem:[#allocation13 + $0x18] sm:$0xf] }
  0xcf   :  { %v2856_v8 = vor.u32 %v3410_v7, %v2855_v6  ;;  %v3391_v10 = vld [vmem:[#allocation10 + $0x60] sm:$0xff] }
  0xd0   :  { %v394_v17 = vpack.c.bf16 %v391_v14, %v391_v14  ;;  %v395_v18 = vpack.c.bf16 %v392_v15, %v392_v15  ;;  %v2844_v14 = vor.u32 %v3407_v12, %v2843_v11  ;;  %v3379_v15 = vld [vmem:[#allocation10] sm:$0xff]  ;;  %v3408_v12 = vld [vmem:[#allocation13 + $0x28] sm:$0xf0] }
  0xd1   :  { %v360_v23 = vpop.f32.mrf.mxu0  ;;  %v373_v24 = vpop.f32.mrf.mxu1  ;;  %v2851_v11 = vld [vmem:[#allocation13 + $0x20] sm:$0xf] }
  0xd2   :  { %v384_v19 = vpop.f32.mrf.mxu2  ;;  %893 = vmatmul.bf16.vlgmr.msra.gmra.mxu3 %v394_v17  ;;  %906 = vmatmul.bf16.vlgmr.msrb.gmra.mxu0 %v395_v18  ;;  %v2893_v23 = vld [vmem:[#allocation13 + $0x84] sm:$0xf0] }
  0xd3   :  { %v385_v22 = vadd.f32 %v384_v19, %v227_v13  ;;  %932 = vmatmul.bf16.vlgmr.msrb.gmra.mxu2 %v394_v17  ;;  %989 = vmatpush.bf16.msra.mxu3 %v2732_v16  ;;  %v1346_v13 = vunpack.c.h.b16 %v1273_v48  ;;  %v2831_v19 = vld [vmem:[#allocation13] sm:$0xf]  ;;  %v3406_v48 = vld [vmem:[#allocation13 + $0x1c] sm:$0xf] }
  0xd4   :  { %1207 = vmatpush.bf16.msrb.mxu0 %v3386_v25  ;;  %v2832_v21 = vor.u32 %v3404_v20, %v2831_v19  ;;  %v3389_v25 = vld [vmem:[#allocation10 + $0x50] sm:$0xff]  ;;  %1233 = vmatpush.bf16.msrb.mxu2 %v3402_v29  ;;  %v2990_v29 = vld [vmem:[#allocation15 + $0xa8] sm:$0xf] }
  0xd5   :  { %v390_v26 = vmul.f32 0.01, %v385_v22  ;;  %v1367_v16 = vpack.c.b16 %v1346_v13, %v1346_v13 }
  0xd7   :  { %v393_v31 = vmax.f32 %v385_v22, %v390_v26  ;;  %990 = vmatpush.bf16.msra.mxu3 %v2720_v27  ;;  %v3418_v22 = vld [vmem:[#allocation13 + $0x7c] sm:$0xf]  ;;  %v3415_v27 = vld [vmem:[#allocation13 + $0x64] sm:$0xf] }
  0xd8   :  { %1208 = vmatpush.bf16.msrb.mxu0 %v3385_v30  ;;  %v2896_v24 = vor.u32 %v3418_v22, %v2893_v23  ;;  %v3938_v26 = vld [vmem:[#allocation4] sm:$0xf]  ;;  %v2884_v30 = vor.u32 %v3415_v27, %v2881_v28  ;;  %1234 = vmatpush.bf16.msrb.mxu2 %v3401_v36  ;;  %v2966_v36 = vld [vmem:[#allocation15 + $0x78] sm:$0xf] }
  0xd9   :  { %v396_v33 = vpack.c.bf16 %v393_v31, %v393_v31  ;;  %v3388_v31 = vld [vmem:[#allocation10 + $0x48] sm:$0xff] }
  0xda   :  { %v386_v35 = vpop.f32.mrf.mxu2 }
  0xdb   :  { %919 = vmatmul.bf16.vlgmr.msrb.gmra.mxu1 %v396_v33  ;;  %991 = vmatpush.bf16.msra.mxu3 %v2708_v34  ;;  %v2869_v34 = vld [vmem:[#allocation13 + $0x54] sm:$0xf0] }
  0xdc   :  { %1220 = vmatpush.bf16.msrb.mxu1 %v3394_v32  ;;  %1209 = vmatpush.bf16.msrb.mxu0 %v3384_v38  ;;  %v1274_v32 = vld [vmem:[#allocation13 + $0x98] sm:$0x3]  ;;  %v3387_v38 = vld [vmem:[#allocation10 + $0x40] sm:$0xff] }
  0xdd   :  { %v1347_v35 = vunpack.c.l.b16 %v1274_v32 }
  0xdf   :  { %992 = vmatpush.bf16.msra.mxu3 %v2696_v40 }
  0xe0   :  { %1221 = vmatpush.bf16.msrb.mxu1 %v3393_v39  ;;  %1210 = vmatpush.bf16.msrb.mxu0 %v3383_v43  ;;  %v1368_v39 = vpack.c.b16 %v1347_v35, %v1347_v35  ;;  %v3400_v43 = vld [vmem:[#allocation10 + $0xa8] sm:$0xff] }
  0xe1   :  { %1235 = vmatpush.bf16.msrb.mxu2 %v3400_v43 }
  0xe2   :  { %945 = vmatmul.bf16.vlgmr.msrb.gmra.mxu3 %v395_v18  ;;  %958 = vmatmul.bf16.vlgmr.msra.gmra.mxu0 %v396_v33  ;;  %v1397_v40 = vsel %vm339_vm0, %v1368_v39, 0 }
  0xe3   :  { %984 = vmatmul.bf16.vlgmr.msra.gmra.mxu2 %v395_v18  ;;  %993 = vmatpush.bf16.msra.mxu3 %v2684_v44  ;;  %v3390_v18 = vld [vmem:[#allocation10 + $0x58] sm:$0xff]  ;;  %v2860_v44 = vor.u32 %v3409_v41, %v2857_v42 }
  0xe4   :  { %1211 = vmatpush.bf16.msrb.mxu0 %v3382_v47  ;;  %1222 = vmatpush.bf16.msrb.mxu1 %v3392_v5  ;;  %v2900_v47 = vor.u32 %v3420_v46, %v2899_v45  ;;  %v3434_v46 = vld [vmem:[#allocation15 + $0x68] sm:$0xf0] }
  0xe5   :  { %1236 = vmatpush.bf16.msrb.mxu2 %v3399_v50  ;;  %v2992_v50 = vld [vmem:[#allocation15 + $0xb4] sm:$0xf0] }
  0xe7   :  { %994 = vmatpush.bf16.msra.mxu3 %v2672_v49  ;;  %v2845_v49 = vld [vmem:[#allocation13 + $0x24] sm:$0xf0] }
  0xe8   :  { %1212 = vmatpush.bf16.msrb.mxu0 %v3381_v52  ;;  %1223 = vmatpush.bf16.msrb.mxu1 %v3391_v10  ;;  %v2848_v51 = vor.u32 %v3406_v48, %v2845_v49  ;;  %v2887_v52 = vld [vmem:[#allocation13 + $0x68] sm:$0xf]  ;;  %v3467_v48 = vld [vmem:[#allocation15 + $0x170] sm:$0xf0] }
  0xe9   :  { %1237 = vmatpush.bf16.msrb.mxu2 %v3398_v57  ;;  %v3442_v49 = vld [vmem:[#allocation15 + $0xac] sm:$0xf]  ;;  %v2942_v57 = vld [vmem:[#allocation15 + $0x48] sm:$0xf] }
  0xeb   :  { %971 = vmatmul.bf16.vlgmr.msra.gmra.mxu1 %v394_v17  ;;  %995 = vmatpush.bf16.msra.mxu3 %v2660_v54  ;;  %v1394_v17 = vsel %vm339_vm0, %v1367_v16, 0  ;;  %v2888_v54 = vor.u32 %v3417_v53, %v2887_v52  ;;  %v3395_v16 = vld [vmem:[#allocation10 + $0x80] sm:$0xff]  ;;  %v3074_v53 = vld [vmem:[#allocation15 + $0x150] sm:$0xf] }
  0xec   :  { %1213 = vmatpush.bf16.msrb.mxu0 %v3380_v9  ;;  %1224 = vmatpush.bf16.msrb.mxu1 %v3390_v18  ;;  %v3396_v9 = vld [vmem:[#allocation10 + $0x88] sm:$0xff]  ;;  %v3405_v18 = vld [vmem:[#allocation13 + $0x10] sm:$0xf0] }
  0xef   :  { %996 = vmatpush.bf16.msra.mxu3 %v2648_v58  ;;  %v2836_v58 = vor.u32 %v3403_v55, %v2833_v56  ;;  %v497_v55 = vperm.slane %v3946_v60, 2 }
  0xf0   :  { %1214 = vmatpush.bf16.msrb.mxu0 %v3379_v15  ;;  %1225 = vmatpush.bf16.msrb.mxu1 %v3389_v25  ;;  %v496_v25 = vperm.slane %v3946_v60, 1 }
  0xf2   :  { %997 = vmatmul.bf16.vlgmr.msra.gmra.mxu3 %v396_v33  ;;  %v3412_v33 = vld [vmem:[#allocation13 + $0x4c] sm:$0xf] }
  0xf3   :  { %1400 = vmatpush.bf16.msrb.mxu3 %v1391_v59  ;;  %v2872_v37 = vor.u32 %v3412_v33, %v2869_v34  ;;  %v3440_v33 = vld [vmem:[#allocation15 + $0x98] sm:$0xf0] }
  0xf4   :  { %1413 = vmatpush.bf16.msra.mxu0 %v1394_v17  ;;  %1226 = vmatpush.bf16.msrb.mxu1 %v3388_v31  ;;  %v2839_v17 = vld [vmem:[#allocation13 + $0x8] sm:$0xf]  ;;  %v2978_v31 = vld [vmem:[#allocation15 + $0x90] sm:$0xf] }
  0xf5   :  { %v2840_v20 = vor.u32 %v3405_v18, %v2839_v17  ;;  %v2979_v34 = vor.u32 %v3440_v33, %v2978_v31  ;;  %v2968_v17 = vld [vmem:[#allocation15 + $0x84] sm:$0xf0]  ;;  %v3433_v33 = vld [vmem:[#allocation15 + $0x64] sm:$0xf] }
  0xf7   :  { %1401 = vmatpush.bf16.msrb.mxu3 %v2892_v62  ;;  %v3414_v62 = vld [vmem:[#allocation13 + $0x58] sm:$0xf0] }
  0xf8   :  { %1414 = vmatpush.bf16.msra.mxu0 %v2896_v24  ;;  %1227 = vmatpush.bf16.msrb.mxu1 %v3387_v38  ;;  %v2876_v63 = vor.u32 %v3414_v62, %v2875_v61  ;;  %v3431_v61 = vld [vmem:[#allocation15 + $0x50] sm:$0xf0]  ;;  %v3062_v62 = vld [vmem:[#allocation15 + $0x138] sm:$0xf] }
  0xfb   :  { %1402 = vmatpush.bf16.msrb.mxu3 %v2880_v1  ;;  %v3397_v1 = vld [vmem:[#allocation10 + $0x90] sm:$0xff] }
  0xfc   :  { %1415 = vmatpush.bf16.msra.mxu0 %v2884_v30  ;;  %1426 = vmatpush.bf16.msra.mxu1 %v1397_v40  ;;  %v3443_v30 = vld [vmem:[#allocation15 + $0xb0] sm:$0xf0] }
  0xfd   :  { %1238 = vmatpush.bf16.msrb.mxu2 %v3397_v1  ;;  %v2991_v32 = vor.u32 %v3443_v30, %v2990_v29  ;;  %v2995_v1 = vor.u32 %v3442_v49, %v2992_v50 }
  0xff   :  { %1403 = vmatpush.bf16.msrb.mxu3 %v2868_v4  ;;  %v2864_v4 = vor.u32 %v3411_v3, %v2863_v2 }
 0x100   :  { %1416 = vmatpush.bf16.msra.mxu0 %v2872_v37  ;;  %1427 = vmatpush.bf16.msra.mxu1 %v2900_v47  ;;  %v3437_v37 = vld [vmem:[#allocation15 + $0x80] sm:$0xf0]  ;;  %v3086_v47 = vld [vmem:[#allocation15 + $0x168] sm:$0xf] }
 0x101   :  { %1239 = vmatpush.bf16.msrb.mxu2 %v3396_v9  ;;  %v2967_v43 = vor.u32 %v3437_v37, %v2966_v36 }
 0x103   :  { %1404 = vmatpush.bf16.msrb.mxu3 %v2856_v8 }
 0x104   :  { %1417 = vmatpush.bf16.msra.mxu0 %v2860_v44  ;;  %1428 = vmatpush.bf16.msra.mxu1 %v2888_v54  ;;  %v2954_v44 = vld [vmem:[#allocation15 + $0x60] sm:$0xf]  ;;  %v3464_v54 = vld [vmem:[#allocation15 + $0x158] sm:$0xf0] }
 0x105   :  { %1240 = vmatpush.bf16.msrb.mxu2 %v3395_v16  ;;  %v2955_v56 = vor.u32 %v3434_v46, %v2954_v44  ;;  %v3436_v16 = vld [vmem:[#allocation15 + $0x7c] sm:$0xf]  ;;  %v3430_v44 = vld [vmem:[#allocation15 + $0x4c] sm:$0xf] }
 0x106   :  { %v2971_v30 = vor.u32 %v3436_v16, %v2968_v17 }
 0x107   :  { %1405 = vmatpush.bf16.msrb.mxu3 %v2844_v14  ;;  %v2852_v14 = vor.u32 %v3408_v12, %v2851_v11  ;;  %v3050_v11 = vld [vmem:[#allocation15 + $0x120] sm:$0xf]  ;;  %v3458_v12 = vld [vmem:[#allocation15 + $0x128] sm:$0xf0] }
 0x108   :  { %1418 = vmatpush.bf16.msra.mxu0 %v2848_v51  ;;  %1429 = vmatpush.bf16.msra.mxu1 %v2876_v63  ;;  %v3087_v51 = vor.u32 %v3467_v48, %v3086_v47  ;;  %v3461_v63 = vld [vmem:[#allocation15 + $0x140] sm:$0xf0] }
 0x109   :  { %1935 = vmatpush.bf16.msra.mxu2 %v2991_v32  ;;  %v3063_v60 = vor.u32 %v3461_v63, %v3062_v62 }
 0x10b   :  { %1406 = vmatpush.bf16.msrb.mxu3 %v2832_v21 }
 0x10c   :  { %1419 = vmatpush.bf16.msra.mxu0 %v2836_v58  ;;  %1430 = vmatpush.bf16.msra.mxu1 %v2864_v4  ;;  %v3075_v58 = vor.u32 %v3464_v54, %v3074_v53  ;;  %v3427_v53 = vld [vmem:[#allocation15 + $0x34] sm:$0xf]  ;;  %v2932_v54 = vld [vmem:[#allocation15 + $0x3c] sm:$0xf0] }
 0x10d   :  { %1936 = vmatpush.bf16.msra.mxu2 %v2979_v34  ;;  %v2956_v34 = vld [vmem:[#allocation15 + $0x6c] sm:$0xf0] }
 0x10e   :  { %2901 = vmatmul.msk.bf16.vlgmr.msrb.gmra.mxu3 %vm335_vm1, %v3938_v26 }
 0x10f   :  { %1948 = vmatpush.bf16.msra.mxu3 %v3087_v51  ;;  %v3463_v51 = vld [vmem:[#allocation15 + $0x154] sm:$0xf] }
 0x110   :  { %1431 = vmatpush.bf16.msra.mxu1 %v2852_v14  ;;  %v3182_v14 = vld [vmem:[#allocation15 + $0x228] sm:$0xf] }
 0x111   :  { %1937 = vmatpush.bf16.msra.mxu2 %v2967_v43 }
 0x113   :  { %1949 = vmatpush.bf16.msra.mxu3 %v3075_v58  ;;  %v3064_v58 = vld [vmem:[#allocation15 + $0x144] sm:$0xf0] }
 0x114   :  { %1432 = vmatpush.bf16.msra.mxu1 %v2840_v20  ;;  %v2918_v20 = vld [vmem:[#allocation15 + $0x18] sm:$0xf] }
 0x115   :  { %1938 = vmatpush.bf16.msra.mxu2 %v2955_v56  ;;  %v2935_v56 = vor.u32 %v3427_v53, %v2932_v54  ;;  %v3046_v54 = vld [vmem:[#allocation15 + $0x110] sm:$0xf] }
 0x117   :  { %1950 = vmatpush.bf16.msra.mxu3 %v3063_v60 }
 0x14f   :  { %v907_v59 = vpop.f32.mrf.mxu0 }
 0x155   :  { %v894_v5 = vpop.f32.mrf.mxu3 }
 0x156   :  { %v895_v6 = vadd.f32 %v894_v5, %v495_v0  ;;  %v933_v8 = vpop.f32.mrf.mxu2  ;;  %v3439_v5 = vld [vmem:[#allocation15 + $0x94] sm:$0xf] }
 0x157   :  { %v909_v10 = vpop.f32.mrf.mxu0  ;;  %v934_v35 = vadd.f32 %v933_v8, %v496_v25  ;;  %v2930_v8 = vld [vmem:[#allocation15 + $0x30] sm:$0xf]  ;;  %v3038_v25 = vld [vmem:[#allocation15 + $0x108] sm:$0xf] }
 0x158   :  { %v920_v7 = vpop.f32.mrf.mxu1  ;;  %v908_v13 = vadd.f32 %v907_v59, %v895_v6  ;;  %v2980_v6 = vld [vmem:[#allocation15 + $0x9c] sm:$0xf0]  ;;  %v3428_v10 = vld [vmem:[#allocation15 + $0x38] sm:$0xf0] }
 0x15a   :  { %v921_v15 = vadd.f32 %v920_v7, %v908_v13  ;;  %v2943_v7 = vor.u32 %v3431_v61, %v2942_v57  ;;  %v2983_v13 = vor.u32 %v3439_v5, %v2980_v6  ;;  %v3460_v57 = vld [vmem:[#allocation15 + $0x13c] sm:$0xf]  ;;  %v2920_v61 = vld [vmem:[#allocation15 + $0x24] sm:$0xf0] }
 0x15b   :  { %v3067_v62 = vor.u32 %v3460_v57, %v3064_v58  ;;  %v3468_v5 = vld [vmem:[#allocation15 + $0x178] sm:$0xf0] }
 0x15c   :  { %v1002_v19 = vmul.f32 0.01, %v921_v15  ;;  %1939 = vmatpush.bf16.msra.mxu2 %v2943_v7  ;;  %v3454_v7 = vld [vmem:[#allocation15 + $0x10c] sm:$0xf] }
 0x15d   :  { %v896_v21 = vpop.f32.mrf.mxu3 }
 0x15e   :  { %v1005_v22 = vmax.f32 %v921_v15, %v1002_v19  ;;  %v935_v24 = vpop.f32.mrf.mxu2  ;;  %v3491_v15 = vld [vmem:[#allocation15 + $0x230] sm:$0xf0]  ;;  %v2931_v19 = vor.u32 %v3428_v10, %v2930_v8  ;;  %v3425_v21 = vld [vmem:[#allocation15 + $0x20] sm:$0xf0]  ;;  %v3040_v8 = vld [vmem:[#allocation15 + $0x114] sm:$0xf0] }
 0x15f   :  { %v959_v27 = vpop.f32.mrf.mxu0  ;;  %v3183_v18 = vor.u32 %v3491_v15, %v3182_v14  ;;  %v3465_v10 = vld [vmem:[#allocation15 + $0x160] sm:$0xf0]  ;;  %v3026_v14 = vld [vmem:[#allocation15 + $0xf0] sm:$0xf]  ;;  %v3452_v15 = vld [vmem:[#allocation15 + $0xf8] sm:$0xf0] }
 0x160   :  { %v922_v23 = vpop.f32.mrf.mxu1  ;;  %v1008_v28 = vpack.c.bf16 %v1005_v22, %v1005_v22  ;;  %v3051_v22 = vor.u32 %v3458_v12, %v3050_v11  ;;  %1940 = vmatpush.bf16.msra.mxu2 %v2931_v19  ;;  %v3043_v11 = vor.u32 %v3454_v7, %v3040_v8  ;;  %v3027_v17 = vor.u32 %v3452_v15, %v3026_v14  ;;  %v3028_v19 = vld [vmem:[#allocation15 + $0xfc] sm:$0xf0] }
 0x161   :  { %v3170_v23 = vld [vmem:[#allocation15 + $0x210] sm:$0xf]  ;;  %v3022_v14 = vld [vmem:[#allocation15 + $0xe0] sm:$0xf] }
 0x162   :  { %1215 = vmatmul.bf16.vlgmr.msrb.gmra.mxu0 %v1008_v28  ;;  %v3488_v28 = vld [vmem:[#allocation15 + $0x218] sm:$0xf0]  ;;  %1951 = vmatpush.bf16.msra.mxu3 %v3051_v22  ;;  %v3070_v22 = vld [vmem:[#allocation15 + $0x140] sm:$0xf] }
 0x163   :  { %1961 = vmatpush.bf16.msrb.mxu0 %v3183_v18  ;;  %v3171_v31 = vor.u32 %v3488_v28, %v3170_v23  ;;  %v3451_v18 = vld [vmem:[#allocation15 + $0xf4] sm:$0xf]  ;;  %v3462_v23 = vld [vmem:[#allocation15 + $0x148] sm:$0xf0]  ;;  %v3485_v28 = vld [vmem:[#allocation15 + $0x200] sm:$0xf0] }
 0x165   :  { %v946_v38 = vpop.f32.mrf.mxu3 }
 0x166   :  { %v947_v39 = vadd.f32 %v946_v38, %v934_v35  ;;  %v985_v41 = vpop.f32.mrf.mxu2  ;;  %v2919_v35 = vor.u32 %v3425_v21, %v2918_v20  ;;  %v2906_v38 = vld [vmem:[#allocation15] sm:$0xf]  ;;  %v3031_v21 = vor.u32 %v3451_v18, %v3028_v19  ;;  %v3486_v18 = vld [vmem:[#allocation15 + $0x208] sm:$0xf0] }
 0x167   :  { %v961_v42 = vpop.f32.mrf.mxu0  ;;  %1962 = vmatpush.bf16.msrb.mxu0 %v3171_v31 }
 0x168   :  { %v972_v40 = vpop.f32.mrf.mxu1  ;;  %v960_v45 = vadd.f32 %v959_v27, %v947_v39  ;;  %v3455_v27 = vld [vmem:[#allocation15 + $0x110] sm:$0xf0]  ;;  %v3422_v39 = vld [vmem:[#allocation15 + $0x8] sm:$0xf0]  ;;  %v3088_v42 = vld [vmem:[#allocation15 + $0x174] sm:$0xf0]  ;;  %1941 = vmatpush.bf16.msra.mxu2 %v2919_v35 }
 0x169   :  { %v973_v9 = vadd.f32 %v972_v40, %v497_v55  ;;  %v3039_v36 = vor.u32 %v3455_v27, %v3038_v25  ;;  %v2959_v40 = vor.u32 %v3433_v33, %v2956_v34  ;;  %v2907_v46 = vor.u32 %v3422_v39, %v2906_v38  ;;  %v3448_v33 = vld [vmem:[#allocation15 + $0xdc] sm:$0xf]  ;;  %v3016_v34 = vld [vmem:[#allocation15 + $0xe4] sm:$0xf0]  ;;  %v3459_v38 = vld [vmem:[#allocation15 + $0x130] sm:$0xf0] }
 0x16a   :  { %v1003_v52 = vmul.f32 0.01, %v960_v45  ;;  %v3071_v27 = vor.u32 %v3462_v23, %v3070_v22  ;;  %v3058_v35 = vld [vmem:[#allocation15 + $0x128] sm:$0xf]  ;;  %v3146_v39 = vld [vmem:[#allocation15 + $0x1e0] sm:$0xf] }
 0x16b   :  { %v986_v24 = vadd.f32 %v985_v41, %v973_v9  ;;  %v3466_v41 = vld [vmem:[#allocation15 + $0x16c] sm:$0xf]  ;;  %1952 = vmatpush.bf16.msra.mxu3 %v3039_v36  ;;  %v3082_v9 = vld [vmem:[#allocation15 + $0x158] sm:$0xf]  ;;  %v3473_v22 = vld [vmem:[#allocation15 + $0x1a0] sm:$0xf0] }
 0x16c   :  { %v1006_v59 = vmax.f32 %v960_v45, %v1003_v52  ;;  %v2944_v45 = vld [vmem:[#allocation15 + $0x54] sm:$0xf0]  ;;  %v3091_v48 = vor.u32 %v3466_v41, %v3088_v42  ;;  %v3076_v52 = vld [vmem:[#allocation15 + $0x15c] sm:$0xf0]  ;;  %1942 = vmatpush.bf16.msra.mxu2 %v2907_v46  ;;  %v3083_v12 = vor.u32 %v3465_v10, %v3082_v9  ;;  %v3482_v41 = vld [vmem:[#allocation15 + $0x1e8] sm:$0xf0] }
 0x16d   :  { %v948_v0 = vpop.f32.mrf.mxu3  ;;  %v2947_v50 = vor.u32 %v3430_v44, %v2944_v45  ;;  %v3079_v55 = vor.u32 %v3463_v51, %v3076_v52  ;;  %v3002_v44 = vld [vmem:[#allocation15 + $0xc0] sm:$0xf]  ;;  %v3446_v45 = vld [vmem:[#allocation15 + $0xc8] sm:$0xf0]  ;;  %v3445_v46 = vld [vmem:[#allocation15 + $0xc4] sm:$0xf] }
 0x16e   :  { %v1009_v2 = vpack.c.bf16 %v1006_v59, %v1006_v59  ;;  %v987_v4 = vpop.f32.mrf.mxu2  ;;  %v3424_v59 = vld [vmem:[#allocation15 + $0x1c] sm:$0xf]  ;;  %v3457_v0 = vld [vmem:[#allocation15 + $0x124] sm:$0xf]  ;;  %v3184_v51 = vld [vmem:[#allocation15 + $0x234] sm:$0xf0] }
 0x16f   :  { %v2923_v63 = vor.u32 %v3424_v59, %v2920_v61  ;;  %v3094_v4 = vld [vmem:[#allocation15 + $0x170] sm:$0xf]  ;;  %1953 = vmatpush.bf16.msra.mxu3 %v3027_v17  ;;  %v3492_v59 = vld [vmem:[#allocation15 + $0x238] sm:$0xf0]  ;;  %v3134_v61 = vld [vmem:[#allocation15 + $0x1c8] sm:$0xf] }
 0x170   :  { %v974_v3 = vpop.f32.mrf.mxu1  ;;  %1228 = vmatmul.bf16.vlgmr.msrb.gmra.mxu1 %v1009_v2  ;;  %v3421_v2 = vld [vmem:[#allocation15 + $0x4] sm:$0xf]  ;;  %v3095_v60 = vor.u32 %v3468_v5, %v3094_v4  ;;  %v3476_v9 = vld [vmem:[#allocation15 + $0x1b8] sm:$0xf0]  ;;  %v3166_v17 = vld [vmem:[#allocation15 + $0x200] sm:$0xf] }
 0x171   :  { %1974 = vmatpush.bf16.msrb.mxu1 %v2995_v1  ;;  %v3052_v1 = vld [vmem:[#allocation15 + $0x12c] sm:$0xf0]  ;;  %v3453_v5 = vld [vmem:[#allocation15 + $0x100] sm:$0xf0] }
 0x172   :  { %2902 = vmatmul.msk.bf16.vlgmr.msra.gmra.mxu0 %vm335_vm1, %v3938_v26  ;;  %v2908_v3 = vld [vmem:[#allocation15 + $0xc] sm:$0xf0] }
 0x173   :  { %v2911_v6 = vor.u32 %v3421_v2, %v2908_v3  ;;  %v3172_v2 = vld [vmem:[#allocation15 + $0x21c] sm:$0xf0]  ;;  %v3034_v3 = vld [vmem:[#allocation15 + $0xf8] sm:$0xf] }
 0x174   :  { %v3035_v7 = vor.u32 %v3453_v5, %v3034_v3  ;;  %v2962_v3 = vld [vmem:[#allocation15 + $0x68] sm:$0xf] }
 0x175   :  { %v998_v29 = vpop.f32.mrf.mxu3  ;;  %1975 = vmatpush.bf16.msrb.mxu1 %v2983_v13  ;;  %v3958_v13 = vld [vmem:[%s3991_s9] sm:$0x7] }
 0x176   :  { %v999_v32 = vadd.f32 %v998_v29, %v986_v24  ;;  %v1277_v16 = vperm.slane %v3958_v13, 0  ;;  %v3158_v24 = vld [vmem:[#allocation15 + $0x1f8] sm:$0xf] }
 0x177   :  { %v3014_v29 = vld [vmem:[#allocation15 + $0xd8] sm:$0xf]  ;;  %v3159_v31 = vor.u32 %v3485_v28, %v3158_v24  ;;  %v3481_v24 = vld [vmem:[#allocation15 + $0x1e4] sm:$0xf] }
 0x178   :  { %v1004_v37 = vmul.f32 0.01, %v999_v32 }
 0x179   :  { %1976 = vmatpush.bf16.msrb.mxu1 %v2971_v30  ;;  %v3449_v30 = vld [vmem:[#allocation15 + $0xe0] sm:$0xf0]  ;;  %1963 = vmatpush.bf16.msrb.mxu0 %v3159_v31  ;;  %v3483_v31 = vld [vmem:[#allocation15 + $0x1f0] sm:$0xf0] }
 0x17a   :  { %v1007_v43 = vmax.f32 %v999_v32, %v1004_v37  ;;  %v3015_v32 = vor.u32 %v3449_v30, %v3014_v29  ;;  %v3019_v37 = vor.u32 %v3448_v33, %v3016_v34  ;;  %v3447_v29 = vld [vmem:[#allocation15 + $0xd0] sm:$0xf0]  ;;  %v3154_v30 = vld [vmem:[#allocation15 + $0x1e8] sm:$0xf]  ;;  %v3098_v34 = vld [vmem:[#allocation15 + $0x180] sm:$0xf] }
 0x17b   :  { %v3155_v33 = vor.u32 %v3483_v31, %v3154_v30 }
 0x17c   :  { %v1010_v47 = vpack.c.bf16 %v1007_v43, %v1007_v43  ;;  %1954 = vmatpush.bf16.msra.mxu3 %v3015_v32  ;;  %v3147_v43 = vor.u32 %v3482_v41, %v3146_v39  ;;  %v3136_v41 = vld [vmem:[#allocation15 + $0x1d4] sm:$0xf0] }
 0x17d   :  { %v1000_v49 = vpop.f32.mrf.mxu3  ;;  %1977 = vmatpush.bf16.msrb.mxu1 %v2959_v40  ;;  %v3059_v40 = vor.u32 %v3459_v38, %v3058_v35  ;;  %v3470_v35 = vld [vmem:[#allocation15 + $0x188] sm:$0xf0]  ;;  %v3444_v38 = vld [vmem:[#allocation15 + $0xb8] sm:$0xf0] }
 0x17e   :  { %1241 = vmatmul.bf16.vlgmr.msrb.gmra.mxu2 %v1010_v47  ;;  %v3004_v49 = vld [vmem:[#allocation15 + $0xcc] sm:$0xf0]  ;;  %1964 = vmatpush.bf16.msrb.mxu0 %v3147_v43 }
 0x17f   :  { %1987 = vmatpush.bf16.msrb.mxu2 %v3091_v48  ;;  %v3003_v48 = vor.u32 %v3446_v45, %v3002_v44  ;;  %v3007_v52 = vor.u32 %v3445_v46, %v3004_v49  ;;  %v3480_v44 = vld [vmem:[#allocation15 + $0x1d8] sm:$0xf0]  ;;  %v2986_v46 = vld [vmem:[#allocation15 + $0x98] sm:$0xf] }
 0x180   :  { %2903 = vmatmul.msk.bf16.vlgmr.msra.gmra.mxu1 %vm335_vm1, %v3938_v26  ;;  %v3055_v26 = vor.u32 %v3457_v0, %v3052_v1  ;;  %v3487_v1 = vld [vmem:[#allocation15 + $0x214] sm:$0xf] }
 0x181   :  { %1978 = vmatpush.bf16.msrb.mxu1 %v2947_v50  ;;  %v3490_v50 = vld [vmem:[#allocation15 + $0x22c] sm:$0xf]  ;;  %1955 = vmatpush.bf16.msra.mxu3 %v3003_v48  ;;  %v3175_v4 = vor.u32 %v3487_v1, %v3172_v2  ;;  %v3441_v48 = vld [vmem:[#allocation15 + $0xa0] sm:$0xf0] }
 0x182   :  { %v3187_v53 = vor.u32 %v3490_v50, %v3184_v51  ;;  %v2987_v49 = vor.u32 %v3441_v48, %v2986_v46  ;;  %v3475_v50 = vld [vmem:[#allocation15 + $0x1b4] sm:$0xf]  ;;  %v3124_v51 = vld [vmem:[#allocation15 + $0x1bc] sm:$0xf0]  ;;  %v3474_v1 = vld [vmem:[#allocation15 + $0x1a8] sm:$0xf0] }
 0x183   :  { %1988 = vmatpush.bf16.msrb.mxu2 %v3079_v55  ;;  %v3456_v55 = vld [vmem:[#allocation15 + $0x118] sm:$0xf0] }
 0x184   :  { %v3047_v58 = vor.u32 %v3456_v55, %v3046_v54  ;;  %v3477_v54 = vld [vmem:[#allocation15 + $0x1c0] sm:$0xf0] }
 0x185   :  { %1979 = vmatpush.bf16.msrb.mxu1 %v2935_v56  ;;  %v3190_v56 = vld [vmem:[#allocation15 + $0x230] sm:$0xf]  ;;  %2000 = vmatpush.bf16.msrb.mxu3 %v3187_v53  ;;  %v3127_v53 = vor.u32 %v3475_v50, %v3124_v51  ;;  %v3500_v50 = vld [vmem:[#allocation16 + $0x38] sm:$0xff] }
 0x186   :  { %v3499_v51 = vld [vmem:[#allocation16 + $0x30] sm:$0xff] }
 0x187   :  { %1989 = vmatpush.bf16.msrb.mxu2 %v3067_v62  ;;  %v3479_v62 = vld [vmem:[#allocation15 + $0x1d0] sm:$0xf0] }
 0x188   :  { %v3135_v0 = vor.u32 %v3479_v62, %v3134_v61  ;;  %v3472_v61 = vld [vmem:[#allocation15 + $0x19c] sm:$0xf]  ;;  %v3112_v62 = vld [vmem:[#allocation15 + $0x1a4] sm:$0xf0] }
 0x189   :  { %1980 = vmatpush.bf16.msrb.mxu1 %v2923_v63  ;;  %v3191_v63 = vor.u32 %v3492_v59, %v3190_v56  ;;  %2001 = vmatpush.bf16.msrb.mxu3 %v3175_v4  ;;  %v2974_v56 = vld [vmem:[#allocation15 + $0x80] sm:$0xf]  ;;  %v3435_v4 = vld [vmem:[#allocation15 + $0x70] sm:$0xf0] }
 0x18a   :  { %1965 = vmatpush.bf16.msrb.mxu0 %v3135_v0  ;;  %v3115_v0 = vor.u32 %v3472_v61, %v3112_v62  ;;  %v2963_v5 = vor.u32 %v3435_v4, %v2962_v3  ;;  %v3496_v61 = vld [vmem:[#allocation16 + $0x18] sm:$0xff]  ;;  %v3506_v62 = vld [vmem:[#allocation16 + $0x68] sm:$0xff]  ;;  %v3515_v3 = vld [vmem:[#allocation16 + $0xb0] sm:$0xff] }
 0x18b   :  { %1990 = vmatpush.bf16.msrb.mxu2 %v3055_v26  ;;  %v3178_v26 = vld [vmem:[#allocation15 + $0x218] sm:$0xf]  ;;  %v3493_v4 = vld [vmem:[#allocation16] sm:$0xff] }
 0x18d   :  { %1981 = vmatpush.bf16.msrb.mxu1 %v2911_v6  ;;  %v3489_v6 = vld [vmem:[#allocation15 + $0x220] sm:$0xf0] }
 0x18e   :  { %v3179_v8 = vor.u32 %v3489_v6, %v3178_v26  ;;  %v3469_v26 = vld [vmem:[#allocation15 + $0x184] sm:$0xf]  ;;  %v3100_v6 = vld [vmem:[#allocation15 + $0x18c] sm:$0xf0] }
 0x18f   :  { %1991 = vmatpush.bf16.msrb.mxu2 %v3043_v11  ;;  %v3484_v11 = vld [vmem:[#allocation15 + $0x1fc] sm:$0xf] }
 0x191   :  { %2026 = vmatpush.bf16.msra.mxu1 %v3095_v60  ;;  %v1408_v20 = vpop.f32.mrf.mxu3  ;;  %v3122_v60 = vld [vmem:[#allocation15 + $0x1b0] sm:$0xf] }
 0x192   :  { %v1409_v25 = vadd.f32 %v1408_v20, %v1277_v16  ;;  %v3123_v10 = vor.u32 %v3476_v9, %v3122_v60  ;;  %v3450_v16 = vld [vmem:[#allocation15 + $0xe8] sm:$0xf0]  ;;  %v3167_v20 = vor.u32 %v3486_v18, %v3166_v17  ;;  %v3471_v60 = vld [vmem:[#allocation15 + $0x190] sm:$0xf0]  ;;  %v2926_v18 = vld [vmem:[#allocation15 + $0x20] sm:$0xf] }
 0x193   :  { %1992 = vmatpush.bf16.msrb.mxu2 %v3031_v21  ;;  %v3023_v19 = vor.u32 %v3450_v16, %v3022_v14  ;;  %v3110_v21 = vld [vmem:[#allocation15 + $0x198] sm:$0xf]  ;;  %v3429_v16 = vld [vmem:[#allocation15 + $0x40] sm:$0xf0] }
 0x194   :  { %v1438_v36 = vmul.f32 0.01, %v1409_v25  ;;  %1966 = vmatpush.bf16.msrb.mxu0 %v3123_v10  ;;  %v3111_v23 = vor.u32 %v3473_v22, %v3110_v21  ;;  %v2950_v10 = vld [vmem:[#allocation15 + $0x50] sm:$0xf] }
 0x195   :  { %2027 = vmatpush.bf16.msra.mxu1 %v3083_v12  ;;  %v3160_v12 = vld [vmem:[#allocation15 + $0x204] sm:$0xf0] }
 0x196   :  { %v1441_v42 = vmax.f32 %v1409_v25, %v1438_v36  ;;  %v3163_v15 = vor.u32 %v3484_v11, %v3160_v12  ;;  %v3148_v25 = vld [vmem:[#allocation15 + $0x1ec] sm:$0xf0]  ;;  %v3432_v11 = vld [vmem:[#allocation15 + $0x58] sm:$0xf0] }
 0x197   :  { %1993 = vmatpush.bf16.msrb.mxu2 %v3019_v37  ;;  %v3151_v28 = vor.u32 %v3481_v24, %v3148_v25  ;;  %v2998_v36 = vld [vmem:[#allocation15 + $0xb0] sm:$0xf]  ;;  %v3099_v37 = vor.u32 %v3470_v35, %v3098_v34  ;;  %v2951_v12 = vor.u32 %v3432_v11, %v2950_v10  ;;  %v3423_v24 = vld [vmem:[#allocation15 + $0x10] sm:$0xf0]  ;;  %v3531_v34 = vld [vmem:[#allocation12] ss:$0 sm:$0xff] }
 0x198   :  { %v3961_v47 = vpack.c.bf16 %v1441_v42, %v1441_v42  ;;  %2002 = vmatpush.bf16.msrb.mxu3 %v3163_v15  ;;  %1967 = vmatpush.bf16.msrb.mxu0 %v3111_v23  ;;  %v2999_v39 = vor.u32 %v3444_v38, %v2998_v36  ;;  %v3142_v42 = vld [vmem:[#allocation15 + $0x1d0] sm:$0xf]  ;;  %v2938_v15 = vld [vmem:[#allocation15 + $0x38] sm:$0xf]  ;;  %v2914_v23 = vld [vmem:[#allocation15 + $0x8] sm:$0xf] }
 0x199   :  { %2028 = vmatpush.bf16.msra.mxu1 %v3071_v27  ;;  %v1410_v57 = vpop.f32.mrf.mxu3  ;;  %v3010_v27 = vld [vmem:[#allocation15 + $0xc8] sm:$0xf]  ;;  %v3143_v45 = vor.u32 %v3480_v44, %v3142_v42  ;;  %v2939_v17 = vor.u32 %v3429_v16, %v2938_v15  ;;  %v1279_v35 = vperm.slane %v3958_v13, 2 }
 0x19a   :  { %1943 = vmatmul.bf16.vlgmr.msra.gmra.mxu2 %v3961_v47  ;;  %1982 = vmatmul.bf16.vlgmr.msrb.gmra.mxu1 %v3961_v47  ;;  %v3011_v32 = vor.u32 %v3447_v29, %v3010_v27  ;;  %v3438_v57 = vld [vmem:[#allocation15 + $0x88] sm:$0xf0] }
 0x19b   :  { %1994 = vmatpush.bf16.msrb.mxu2 %v3007_v52  ;;  %v3130_v52 = vld [vmem:[#allocation15 + $0x1b8] sm:$0xf]  ;;  %v3510_v11 = vld [vmem:[#allocation16 + $0x88] sm:$0xff] }
 0x19c   :  { %2003 = vmatpush.bf16.msrb.mxu3 %v3151_v28  ;;  %1968 = vmatpush.bf16.msrb.mxu0 %v3099_v37  ;;  %v3131_v55 = vor.u32 %v3477_v54, %v3130_v52  ;;  %v2915_v28 = vor.u32 %v3423_v24, %v2914_v23 }
 0x19d   :  { %2029 = vmatpush.bf16.msra.mxu1 %v3059_v40  ;;  %v3478_v40 = vld [vmem:[#allocation15 + $0x1cc] sm:$0xf] }
 0x19e   :  { %v3139_v43 = vor.u32 %v3478_v40, %v3136_v41 }
 0x19f   :  { %2039 = vmatpush.bf16.msra.mxu2 %v3191_v63  ;;  %v3118_v63 = vld [vmem:[#allocation15 + $0x1a0] sm:$0xf] }
 0x1a0   :  { %2013 = vmatpush.bf16.msra.mxu0 %v2999_v39  ;;  %2004 = vmatpush.bf16.msrb.mxu3 %v3139_v43  ;;  %v3119_v2 = vor.u32 %v3474_v1, %v3118_v63  ;;  %v3505_v63 = vld [vmem:[#allocation16 + $0x60] sm:$0xff]  ;;  %v3494_v1 = vld [vmem:[#allocation16 + $0x8] sm:$0xff] }
 0x1a1   :  { %2030 = vmatpush.bf16.msra.mxu1 %v3047_v58  ;;  %v2975_v58 = vor.u32 %v3438_v57, %v2974_v56  ;;  %v3498_v56 = vld [vmem:[#allocation16 + $0x28] sm:$0xff]  ;;  %v3508_v57 = vld [vmem:[#allocation16 + $0x78] sm:$0xff] }
 0x1a3   :  { %2040 = vmatpush.bf16.msra.mxu2 %v3179_v8  ;;  %v3103_v8 = vor.u32 %v3469_v26, %v3100_v6  ;;  %v3514_v26 = vld [vmem:[#allocation16 + $0xa8] sm:$0xff] }
 0x1a4   :  { %2014 = vmatpush.bf16.msra.mxu0 %v2987_v49  ;;  %2005 = vmatpush.bf16.msrb.mxu3 %v3127_v53  ;;  %v3502_v6 = vld [vmem:[#allocation16 + $0x48] sm:$0xff] }
 0x1a5   :  { %2031 = vmatpush.bf16.msra.mxu1 %v3035_v7  ;;  %v3106_v7 = vld [vmem:[#allocation15 + $0x188] sm:$0xf] }
 0x1a6   :  { %v3107_v9 = vor.u32 %v3471_v60, %v3106_v7  ;;  %v3513_v7 = vld [vmem:[#allocation16 + $0xa0] sm:$0xff]  ;;  %v3512_v60 = vld [vmem:[#allocation16 + $0x98] sm:$0xff] }
 0x1a7   :  { %2041 = vmatpush.bf16.msra.mxu2 %v3167_v20  ;;  %v1278_v20 = vperm.slane %v3958_v13, 1 }
 0x1a8   :  { %2015 = vmatpush.bf16.msra.mxu0 %v2975_v58  ;;  %2006 = vmatpush.bf16.msrb.mxu3 %v3115_v0  ;;  %v3497_v58 = vld [vmem:[#allocation16 + $0x20] sm:$0xff]  ;;  %v3516_v0 = vld [vmem:[#allocation16 + $0xb8] sm:$0xff] }
 0x1a9   :  { %2032 = vmatpush.bf16.msra.mxu1 %v3023_v19  ;;  %v3426_v19 = vld [vmem:[#allocation15 + $0x28] sm:$0xf0] }
 0x1aa   :  { %v2927_v22 = vor.u32 %v3426_v19, %v2926_v18 }
 0x1ab   :  { %2042 = vmatpush.bf16.msra.mxu2 %v3155_v33 }
 0x1ac   :  { %2016 = vmatpush.bf16.msra.mxu0 %v2963_v5  ;;  %2007 = vmatpush.bf16.msrb.mxu3 %v3103_v8  ;;  %v3503_v5 = vld [vmem:[#allocation16 + $0x50] sm:$0xff]  ;;  %v3501_v8 = vld [vmem:[#allocation16 + $0x40] sm:$0xff] }
 0x1ad   :  { %2033 = vmatpush.bf16.msra.mxu1 %v3011_v32 }
 0x1af   :  { %2043 = vmatpush.bf16.msra.mxu2 %v3143_v45 }
 0x1b0   :  { %2017 = vmatpush.bf16.msra.mxu0 %v2951_v12  ;;  %v1543_v12 = vld [vmem:[%s3993_s11] sm:$0x7] }
 0x1b1   :  { %2283 = vmatpush.bf16.msrb.mxu1 %v3516_v0  ;;  %v1545_v16 = vperm.slane %v1543_v12, 0  ;;  %v1546_v23 = vperm.slane %v1543_v12, 1 }
 0x1b3   :  { %2044 = vmatpush.bf16.msra.mxu2 %v3131_v55 }
 0x1b4   :  { %2018 = vmatpush.bf16.msra.mxu0 %v2939_v17  ;;  %v3509_v17 = vld [vmem:[#allocation16 + $0x80] sm:$0xff] }
 0x1b5   :  { %2284 = vmatpush.bf16.msrb.mxu1 %v3515_v3 }
 0x1b7   :  { %2045 = vmatpush.bf16.msra.mxu2 %v3119_v2  ;;  %v3504_v2 = vld [vmem:[#allocation16 + $0x58] sm:$0xff] }
 0x1b8   :  { %2019 = vmatpush.bf16.msra.mxu0 %v2927_v22 }
 0x1b9   :  { %2285 = vmatpush.bf16.msrb.mxu1 %v3514_v26 }
 0x1bb   :  { %2046 = vmatpush.bf16.msra.mxu2 %v3107_v9  ;;  %v3511_v9 = vld [vmem:[#allocation16 + $0x90] sm:$0xff] }
 0x1bc   :  { %2020 = vmatpush.bf16.msra.mxu0 %v2915_v28 }
 0x1bd   :  { %2286 = vmatpush.bf16.msrb.mxu1 %v3513_v7 }
 0x1c1   :  { %2287 = vmatpush.bf16.msrb.mxu1 %v3512_v60 }
 0x1c5   :  { %2288 = vmatpush.bf16.msrb.mxu1 %v3511_v9 }
 0x1c9   :  { %2289 = vmatpush.bf16.msrb.mxu1 %v3510_v11 }
 0x1cd   :  { %2290 = vmatpush.bf16.msrb.mxu1 %v3509_v17 }
 0x1df   :  { %v1216_v59 = vpop.f32.mrf.mxu0 }
 0x1e0   :  { %v1217_v37 = vadd.f32 %v3531_v34, %v1216_v59  ;;  %v3507_v59 = vld [vmem:[#allocation16 + $0x70] sm:$0xff] }
 0x1e7   :  { %v1218_v14 = vpop.f32.mrf.mxu0 }
 0x1ed   :  { %v1229_v21 = vpop.f32.mrf.mxu1 }
 0x1ee   :  { %v1230_v39 = vadd.f32 %v1229_v21, %v1217_v37 }
 0x1ef   :  { %v1421_v25 = vpop.f32.mrf.mxu0 }
 0x1f0   :  { %v1422_v27 = vadd.f32 %v1421_v25, %v1278_v20 }
 0x1f2   :  { %v1439_v29 = vmul.f32 0.01, %v1422_v27 }
 0x1f4   :  { %v1442_v30 = vmax.f32 %v1422_v27, %v1439_v29 }
 0x1f5   :  { %v1231_v31 = vpop.f32.mrf.mxu1 }
 0x1f6   :  { %v1445_v32 = vpack.c.bf16 %v1442_v30, %v1442_v30 }
 0x1f7   :  { %v1423_v33 = vpop.f32.mrf.mxu0 }
 0x1f8   :  { %1956 = vmatmul.bf16.vlgmr.msra.gmra.mxu3 %v1445_v32  ;;  %1995 = vmatmul.bf16.vlgmr.msrb.gmra.mxu2 %v1445_v32 }
 0x1f9   :  { %2034 = vmatmul.bf16.vlgmr.msra.gmra.mxu1 %v1445_v32  ;;  %2257 = vmatpush.bf16.msra.mxu3 %v3500_v50 }
 0x1fd   :  { %v1434_v36 = vpop.f32.mrf.mxu1  ;;  %2258 = vmatpush.bf16.msra.mxu3 %v3499_v51 }
 0x1fe   :  { %v1435_v38 = vadd.f32 %v1434_v36, %v1279_v35 }
 0x200   :  { %v1440_v40 = vmul.f32 0.01, %v1435_v38 }
 0x201   :  { %v1242_v41 = vpop.f32.mrf.mxu2  ;;  %2259 = vmatpush.bf16.msra.mxu3 %v3498_v56 }
 0x202   :  { %v1443_v42 = vmax.f32 %v1435_v38, %v1440_v40  ;;  %v1243_v43 = vadd.f32 %v1242_v41, %v1230_v39  ;;  %v1547_v38 = vperm.slane %v1543_v12, 2 }
 0x204   :  { %v1446_v44 = vpack.c.bf16 %v1443_v42, %v1443_v42  ;;  %v1246_v45 = vmul.f32 0.01, %v1243_v43 }
 0x205   :  { %v1436_v46 = vpop.f32.mrf.mxu1  ;;  %2260 = vmatpush.bf16.msra.mxu3 %v3497_v58 }
 0x206   :  { %1969 = vmatmul.bf16.vlgmr.msrb.gmra.mxu0 %v1446_v44  ;;  %v3967_v48 = vmax.f32 %v1243_v43, %v1246_v45 }
 0x207   :  { %2270 = vmatpush.bf16.msrb.mxu0 %v3508_v57 }
 0x208   :  { %2008 = vmatmul.bf16.vlgmr.msrb.gmra.mxu3 %v1446_v44  ;;  %2047 = vmatmul.bf16.vlgmr.msra.gmra.mxu2 %v1446_v44  ;;  %v2301_v49 = vmul.f32 %v3967_v48, %v3967_v48 }
 0x209   :  { %v1244_v13 = vpop.f32.mrf.mxu2  ;;  %2261 = vmatpush.bf16.msra.mxu3 %v3496_v61 }
 0x20a   :  { %2302 = vadd.xlane.f32.xlu0 %v2301_v49 }
 0x20b   :  { %2271 = vmatpush.bf16.msrb.mxu0 %v3507_v59 }
 0x20f   :  { %2272 = vmatpush.bf16.msrb.mxu0 %v3506_v62 }
 0x213   :  { %2273 = vmatpush.bf16.msrb.mxu0 %v3505_v63 }
 0x216   :  { %2021 = vmatmul.bf16.vlgmr.msra.gmra.mxu0 %v3961_v47  ;;  %v3495_v47 = vld [vmem:[#allocation16 + $0x10] sm:$0xff] }
 0x217   :  { %v1983_v52 = vpop.f32.mrf.mxu1  ;;  %2262 = vmatpush.bf16.msra.mxu3 %v3495_v47  ;;  %2274 = vmatpush.bf16.msrb.mxu0 %v3504_v2 }
 0x218   :  { %v1984_v28 = vadd.f32 %v1983_v52, %v1546_v23 }
 0x21b   :  { %2263 = vmatpush.bf16.msra.mxu3 %v3494_v1  ;;  %2275 = vmatpush.bf16.msrb.mxu0 %v3503_v5 }
 0x21d   :  { %v1944_v53 = vpop.f32.mrf.mxu2 }
 0x21e   :  { %v1945_v19 = vadd.f32 %v1944_v53, %v1545_v16  ;;  %v3532_v53 = vld [vmem:[%s3995_s13] ss:$0 sm:$0xff] }
 0x21f   :  { %v1985_v54 = vpop.f32.mrf.mxu1  ;;  %2264 = vmatpush.bf16.msra.mxu3 %v3493_v4  ;;  %2276 = vmatpush.bf16.msrb.mxu0 %v3502_v6 }
 0x223   :  { %2277 = vmatpush.bf16.msrb.mxu0 %v3501_v8 }
 0x225   :  { %v1946_v55 = vpop.f32.mrf.mxu2 }
 0x276   :  { %v2035_v10 = vpop.f32.mrf.mxu1 }
 0x27b   :  { %v1957_v14 = vpop.f32.mrf.mxu3  ;;  %v1996_v15 = vpop.f32.mrf.mxu2 }
 0x27c   :  { %v1958_v20 = vadd.f32 %v1957_v14, %v1945_v19  ;;  %v1997_v30 = vadd.f32 %v1996_v15, %v1984_v28 }
 0x27d   :  { %v2303_v1 = vpop.xlane.xlu0 %2302 }
 0x27e   :  { %v2037_v18 = vpop.f32.mrf.mxu1 }
 0x283   :  { %v1959_v21 = vpop.f32.mrf.mxu3  ;;  %v1970_v22 = vpop.f32.mrf.mxu0 }
 0x284   :  { %v1971_v24 = vadd.f32 %v1970_v22, %v1958_v20  ;;  %v1998_v25 = vpop.f32.mrf.mxu2 }
 0x286   :  { %v2052_v27 = vmul.f32 0.01, %v1971_v24 }
 0x288   :  { %v2055_v29 = vmax.f32 %v1971_v24, %v2052_v27 }
 0x28a   :  { %v2058_v31 = vpack.c.bf16 %v2055_v29, %v2055_v29 }
 0x28b   :  { %v1972_v32 = vpop.f32.mrf.mxu0  ;;  %v2009_v33 = vpop.f32.mrf.mxu3 }
 0x28c   :  { %v2010_v34 = vadd.f32 %v2009_v33, %v1997_v30  ;;  %v2048_v35 = vpop.f32.mrf.mxu2  ;;  %2265 = vmatmul.bf16.vlgmr.msra.gmra.mxu3 %v2058_v31 }
 0x28e   :  { %v2053_v36 = vmul.f32 0.01, %v2010_v34 }
 0x290   :  { %v2056_v37 = vmax.f32 %v2010_v34, %v2053_v36 }
 0x292   :  { %v2059_v39 = vpack.c.bf16 %v2056_v37, %v2056_v37 }
 0x293   :  { %v2011_v40 = vpop.f32.mrf.mxu3  ;;  %v2022_v41 = vpop.f32.mrf.mxu0 }
 0x294   :  { %v2023_v42 = vadd.f32 %v2022_v41, %v1547_v38  ;;  %v2050_v43 = vpop.f32.mrf.mxu2  ;;  %2278 = vmatmul.bf16.vlgmr.msrb.gmra.mxu0 %v2059_v39 }
 0x296   :  { %v2036_v44 = vadd.f32 %v2035_v10, %v2023_v42 }
 0x298   :  { %v2049_v45 = vadd.f32 %v2048_v35, %v2036_v44 }
 0x29a   :  { %v2054_v46 = vmul.f32 0.01, %v2049_v45 }
 0x29b   :  { %v2024_v49 = vpop.f32.mrf.mxu0 }
 0x29c   :  { %v2057_v13 = vmax.f32 %v2049_v45, %v2054_v46 }
 0x29e   :  { %v2060_v50 = vpack.c.bf16 %v2057_v13, %v2057_v13 }
 0x2a0   :  { %2291 = vmatmul.bf16.vlgmr.msrb.gmra.mxu1 %v2060_v50 }
 0x30f   :  { %v2266_v51 = vpop.f32.mrf.mxu3 }
 0x310   :  { %v2267_v55 = vadd.f32 %v3532_v53, %v2266_v51 }
 0x311   :  { %v2279_v52 = vpop.f32.mrf.mxu0 }
 0x312   :  { %v2280_v57 = vadd.f32 %v2279_v52, %v2267_v55 }
 0x317   :  { %v2268_v54 = vpop.f32.mrf.mxu3 }
 0x319   :  { %v2281_v56 = vpop.f32.mrf.mxu0 }
 0x31d   :  { %v2292_v58 = vpop.f32.mrf.mxu1 }
 0x31e   :  { %v2293_v59 = vadd.f32 %v2292_v58, %v2280_v57 }
 0x320   :  { %v2296_v61 = vmul.f32 0.01, %v2293_v59 }
 0x322   :  { %v2297_v62 = vmax.f32 %v2293_v59, %v2296_v61 }
 0x324   :  { %v2304_v47 = vmul.f32 %v2297_v62, %v2297_v62  ;;  %v2298_v63 = vmul.f32 %v2297_v62, %v3967_v48 }
 0x325   :  { %v2294_v0 = vpop.f32.mrf.mxu1 }
 0x326   :  { %2305 = vadd.xlane.f32.xlu0 %v2304_v47  ;;  %2299 = vadd.xlane.f32.xlu1 %v2298_v63 }
 0x399   :  { %v2306_v2 = vpop.xlane.xlu0 %2305  ;;  %v2300_v23 = vpop.xlane.xlu1 %2299 }
 0x39a   :  { %v2307_v3 = vmul.f32 %v2306_v2, %v2303_v1 }
 0x39c   :  { %3533 = vrsqrt.f32 %v2307_v3  ;;  %vm2315_vm2 = vcmp.eq.f32.partialorder %v2307_v3, inf  ;;  %v2318_v9 = vand.u32 2147483648, %v2307_v3  ;;  %vm2317_vm3 = vcmp.eq.f32.partialorder %v2307_v3, 0.0 }
 0x3a2   :  { %v3534_v4 = vpop.eup %3533 }
 0x3a3   :  { %v2309_v5 = vmul.f32 %v3534_v4, %v2307_v3 }
 0x3a5   :  { %v2310_v26 = vmul.f32 %v3534_v4, %v2309_v5 }
 0x3a7   :  { %v2311_v6 = vmul.f32 0.5, %v2310_v26 }
 0x3a9   :  { %v2312_v7 = vsub.f32 1.5, %v2311_v6 }
 0x3ab   :  { %v2313_v8 = vmul.f32 %v3534_v4, %v2312_v7 }
 0x3ad   :  { %v2314_v60 = vmul.f32 %v2313_v8, %v2307_v3 }
 0x3af   :  { %v2316_v10 = vsel %vm2315_vm2, %v2307_v3, %v2314_v60 }
 0x3b0   :  { %v2319_v11 = vsel %vm2317_vm3, %v2318_v9, %v2316_v10 }
 0x3b1   :  { %v2320_v48 = vadd.f32 1e-08, %v2319_v11 }
 0x3b3   :  { %3535 = vrcp.f32 %v2320_v48  ;;  %v2332_v16 = vand.u32 2147483648, %v2320_v48  ;;  %v2330_v18 = vand.u32 2147483647, %v2320_v48  ;;  %vm2326_vm5 = vweird.f32 %v2320_v48 }
 0x3b5   :  { %v2333_v20 = vor.u32 1.1754944e-38, %v2332_v16  ;;  %vm2331_vm7 = vcmp.eq.f32.partialorder %v2330_v18, 8.507059e+37 }
 0x3b9   :  { %v3536_v12 = vpop.eup %3535 }
 0x3ba   :  { %v2322_v14 = vmul.f32 %v3536_v12, %v2320_v48  ;;  %vm2327_vm4 = vweird.f32 %v3536_v12 }
 0x3bb   :  { %vm2328_vm6 = vmor %vm2326_vm5, %vm2327_vm4 }
 0x3bc   :  { %v2323_v15 = vsub.f32 1.0, %v2322_v14 }
 0x3be   :  { %v2324_v17 = vmul.f32 %v3536_v12, %v2323_v15 }
 0x3c0   :  { %v2325_v19 = vadd.f32 %v3536_v12, %v2324_v17 }
 0x3c2   :  { %v2329_v21 = vsel %vm2328_vm6, %v3536_v12, %v2325_v19 }
 0x3c3   :  { %v2334_v22 = vsel %vm2331_vm7, %v2333_v20, %v2329_v21 }
 0x3c4   :  { %v2335_v24 = vmul.f32 %v2334_v22, %v2300_v23 }
 0x3c6   :  { %v3288_v25 = vclamps-f32 %v2335_v24, 1.0 }
 0x3c8   :  { %v2339_v27 = vsub.f32 0.0, %v3288_v25 }
 0x3ca   :  { %v2340_v28 = vmul.f32 1.442695, %v2339_v27 }
 0x3cc   :  { %3537 = vpow2.f32 %v2340_v28 }
 0x3d2   :  { %v3538_v29 = vpop.eup %3537 }
 0x3d3   :  { %v2342_v30 = vadd.f32 1.0, %v3538_v29 }
 0x3d5   :  { %3539 = vrcp.f32 %v2342_v30  ;;  %v2354_v34 = vand.u32 2147483648, %v2342_v30  ;;  %v2352_v36 = vand.u32 2147483647, %v2342_v30  ;;  %vm2348_vm9 = vweird.f32 %v2342_v30 }
 0x3d7   :  { %v2355_v38 = vor.u32 1.1754944e-38, %v2354_v34  ;;  %vm2353_vm12 = vcmp.eq.f32.partialorder %v2352_v36, 8.507059e+37 }
 0x3db   :  { %v3540_v31 = vpop.eup %3539 }
 0x3dc   :  { %v2344_v32 = vmul.f32 %v3540_v31, %v2342_v30  ;;  %vm2349_vm8 = vweird.f32 %v3540_v31 }
 0x3dd   :  { %vm2350_vm11 = vmor %vm2348_vm9, %vm2349_vm8 }
 0x3de   :  { %v2345_v33 = vsub.f32 1.0, %v2344_v32 }
 0x3e0   :  { %v2346_v35 = vmul.f32 %v3540_v31, %v2345_v33 }
 0x3e2   :  { %v2347_v37 = vadd.f32 %v3540_v31, %v2346_v35 }
 0x3e4   :  { %v2351_v39 = vsel %vm2350_vm11, %v3540_v31, %v2347_v37 }
 0x3e5   :  { %v2356_v40 = vsel %vm2353_vm12, %v2355_v38, %v2351_v39 }
 0x3e6   :  { %2359 = vst.msk [vmem:[%s3996_s14] sm:$0xff] %vm2358_vm10, %v2356_v40 }
 0x3e7   :  { %2364 = vsyncpa [#allocation3], 1 }
 0x3e8   :  { %2365 = vsyncpa [#allocation5], 1 }
 0x3e9   :  { %2366 = vsyncpa [#allocation8], 1 }
 0x3ea   :  { %2367 = vsyncpa [#allocation11], 1 }
 0x3eb   :  { %2368 = vsyncpa [#allocation14], 1 }
 0x3ec   :  { %2369 = vsyncpa [#allocation17], 1 }

</bundles_post_ra>
